<compile_context>
chip_gen: v5e
topology: v5e:2x2
jax: 0.10.0
libtpu: 0.0.40
codegen_flags: <defaults>
</compile_context>

<pallas_src>
import functools
import math

import jax
import jax.numpy as jnp
from jax.experimental import pallas as pl
from jax.experimental.pallas import tpu as pltpu


def transformer_block_kernel(x_ref, mask_ref,
                             g1_ref, be1_ref,
                             wq_ref, bq_ref,
                             wk_ref, bk_ref,
                             wv_ref, bv_ref,
                             wo_ref, bo_ref,
                             g2_ref, be2_ref,
                             w1_ref, b1_ref,
                             w2_ref, b2_ref,
                             out_ref,
                             *, n_heads):
    S, H = x_ref.shape
    d_k = H // n_heads
    eps = jnp.float32(1e-6)
    inv_sqrt_dk = jnp.float32(1.0 / math.sqrt(d_k))
    neg_big = jnp.float32(-1e9)

    x = x_ref[...]            # (S, H) float32
    mask = mask_ref[...]      # (S, S) int32

    def layer_norm(z, g, b):
        # BERT-pytorch LayerNorm: unbiased std (E-1) and eps added to std.
        mean = jnp.mean(z, axis=-1, keepdims=True)
        zc = z - mean
        var = jnp.sum(zc * zc, axis=-1, keepdims=True) * (1.0 / (H - 1))
        inv = pl.reciprocal(jnp.sqrt(var) + eps, approx=False)
        return g * zc * inv + b

    # ---------- input sublayer: x + MultiHeadAttention(LayerNorm(x)) ----------
    h1 = layer_norm(x, g1_ref[...], be1_ref[...])

    q = jnp.dot(h1, wq_ref[...], preferred_element_type=jnp.float32) + bq_ref[...]
    k = jnp.dot(h1, wk_ref[...], preferred_element_type=jnp.float32) + bk_ref[...]
    v = jnp.dot(h1, wv_ref[...], preferred_element_type=jnp.float32) + bv_ref[...]

    attn_out = jnp.zeros((S, H), jnp.float32)
    for hi in range(n_heads):                      # static unrolled head loop
        lo = hi * d_k
        qh = q[:, lo:lo + d_k]
        kh = k[:, lo:lo + d_k]
        vh = v[:, lo:lo + d_k]
        scores = jnp.dot(qh, kh.T, preferred_element_type=jnp.float32) * inv_sqrt_dk
        scores = jnp.where(mask == 0, neg_big, scores)
        m = jnp.max(scores, axis=-1, keepdims=True)
        e = jnp.exp(scores - m)
        p = e * pl.reciprocal(jnp.sum(e, axis=-1, keepdims=True), approx=False)
        ctx_h = jnp.dot(p, vh, preferred_element_type=jnp.float32)        # (S, d_k)
        # Equivalent to concat(ctx_h over heads) @ Wo, done per head.
        attn_out = attn_out + jnp.dot(ctx_h, wo_ref[lo:lo + d_k, :],
                                      preferred_element_type=jnp.float32)

    x = x + attn_out + bo_ref[...]     # residual (dropout == identity)

    # ---------- output sublayer: x + FeedForward(LayerNorm(x)) ----------------
    h2 = layer_norm(x, g2_ref[...], be2_ref[...])
    hid = jnp.dot(h2, w1_ref[...], preferred_element_type=jnp.float32) + b1_ref[...]
    c = jnp.float32(math.sqrt(2.0 / math.pi))
    hid = 0.5 * hid * (1.0 + jnp.tanh(c * (hid + 0.044715 * hid * hid * hid)))   # GELU (tanh approx)
    ff = jnp.dot(hid, w2_ref[...], preferred_element_type=jnp.float32) + b2_ref[...]

    out_ref[...] = (x + ff).astype(out_ref.dtype)


def transformer_block(x, mask, params, *, n_heads):
    B, S, H = x.shape
    d_ff = params["w1"].shape[1]

    def full_spec(shape):
        return pl.BlockSpec(shape, lambda b: tuple(0 for _ in shape))

    in_specs = [
        pl.BlockSpec((None, S, H), lambda b: (b, 0, 0)),            # x    (batch-tiled)
        pl.BlockSpec((None, None, S, S), lambda b: (b, 0, 0, 0)),   # mask (batch-tiled)
        full_spec((1, H)), full_spec((1, H)),                       # g1, be1
        full_spec((H, H)), full_spec((1, H)),                       # Wq, bq
        full_spec((H, H)), full_spec((1, H)),                       # Wk, bk
        full_spec((H, H)), full_spec((1, H)),                       # Wv, bv
        full_spec((H, H)), full_spec((1, H)),                       # Wo, bo
        full_spec((1, H)), full_spec((1, H)),                       # g2, be2
        full_spec((H, d_ff)), full_spec((1, d_ff)),                 # W1, b1
        full_spec((d_ff, H)), full_spec((1, H)),                    # W2, b2
    ]
    out_specs = pl.BlockSpec((None, S, H), lambda b: (b, 0, 0))

    kernel = functools.partial(transformer_block_kernel, n_heads=n_heads)
    return pl.pallas_call(
        kernel,
        out_shape=jax.ShapeDtypeStruct((B, S, H), jnp.float32),
        grid=(B,),
        in_specs=in_specs,
        out_specs=out_specs,
        compiler_params=pltpu.CompilerParams(
            dimension_semantics=("parallel",)),
    )(x, mask,
      params["g1"], params["be1"],
      params["wq"], params["bq"],
      params["wk"], params["bk"],
      params["wv"], params["bv"],
      params["wo"], params["bo"],
      params["g2"], params["be2"],
      params["w1"], params["b1"],
      params["w2"], params["b2"])


# ------------------------------ pure-JAX reference ----------------------------
def _layer_norm_ref(x, g, b, eps=1e-6):
    mean = x.mean(-1, keepdims=True)
    xc = x - mean
    std = jnp.sqrt((xc * xc).sum(-1, keepdims=True) / (x.shape[-1] - 1))
    return g * xc / (std + eps) + b


def _gelu_ref(x):
    return 0.5 * x * (1 + jnp.tanh(math.sqrt(2 / math.pi) * (x + 0.044715 * x ** 3)))


def transformer_block_ref(x, mask, params, *, n_heads):
    B, S, H = x.shape
    d_k = H // n_heads

    xn = _layer_norm_ref(x, params["g1"].reshape(-1), params["be1"].reshape(-1))
    q = xn @ params["wq"] + params["bq"].reshape(-1)
    k = xn @ params["wk"] + params["bk"].reshape(-1)
    v = xn @ params["wv"] + params["bv"].reshape(-1)
    q = q.reshape(B, S, n_heads, d_k).transpose(0, 2, 1, 3)
    k = k.reshape(B, S, n_heads, d_k).transpose(0, 2, 1, 3)
    v = v.reshape(B, S, n_heads, d_k).transpose(0, 2, 1, 3)

    scores = (q @ k.transpose(0, 1, 3, 2)) / math.sqrt(d_k)
    scores = jnp.where(mask == 0, -1e9, scores)        # mask (B,1,S,S) broadcasts over heads
    p = jax.nn.softmax(scores, axis=-1)
    ctx = (p @ v).transpose(0, 2, 1, 3).reshape(B, S, H)
    x = x + ctx @ params["wo"] + params["bo"].reshape(-1)

    xn2 = _layer_norm_ref(x, params["g2"].reshape(-1), params["be2"].reshape(-1))
    ff = _gelu_ref(xn2 @ params["w1"] + params["b1"].reshape(-1)) @ params["w2"] \
         + params["b2"].reshape(-1)
    return x + ff


if __name__ == "__main__":
    B, S, H, HEADS, D_FF = 2, 8, 32, 4, 128

    key = jax.random.PRNGKey(0)
    ks = jax.random.split(key, 16)

    params = {
        "g1":  1.0 + 0.1 * jax.random.normal(ks[0], (1, H), jnp.float32),
        "be1": 0.1 * jax.random.normal(ks[1], (1, H), jnp.float32),
        "wq":  0.1 * jax.random.normal(ks[2], (H, H), jnp.float32),
        "bq":  0.1 * jax.random.normal(ks[3], (1, H), jnp.float32),
        "wk":  0.1 * jax.random.normal(ks[4], (H, H), jnp.float32),
        "bk":  0.1 * jax.random.normal(ks[5], (1, H), jnp.float32),
        "wv":  0.1 * jax.random.normal(ks[6], (H, H), jnp.float32),
        "bv":  0.1 * jax.random.normal(ks[7], (1, H), jnp.float32),
        "wo":  0.1 * jax.random.normal(ks[8], (H, H), jnp.float32),
        "bo":  0.1 * jax.random.normal(ks[9], (1, H), jnp.float32),
        "g2":  1.0 + 0.1 * jax.random.normal(ks[10], (1, H), jnp.float32),
        "be2": 0.1 * jax.random.normal(ks[11], (1, H), jnp.float32),
        "w1":  0.1 * jax.random.normal(ks[12], (H, D_FF), jnp.float32),
        "b1":  0.1 * jax.random.normal(ks[13], (1, D_FF), jnp.float32),
        "w2":  0.1 * jax.random.normal(ks[14], (D_FF, H), jnp.float32),
        "b2":  0.1 * jax.random.normal(ks[15], (1, H), jnp.float32),
    }

    x = jax.random.normal(jax.random.PRNGKey(1), (B, S, H), jnp.float32)

    # Padding-style attention mask (B, 1, S, S): key position j valid iff j < len[b].
    lens = jnp.array([S, 5], dtype=jnp.int32)
    key_valid = (jnp.arange(S, dtype=jnp.int32)[None, :] < lens[:, None])      # (B, S)
    mask = jnp.broadcast_to(key_valid[:, None, None, :], (B, 1, S, S)).astype(jnp.int32)

    out = transformer_block(x, mask, params, n_heads=HEADS)
    out = jax.block_until_ready(out)

    ref = transformer_block_ref(x, mask, params, n_heads=HEADS)
    assert out.shape == (B, S, H)
    max_err = float(jnp.max(jnp.abs(out - ref)))
    assert jnp.allclose(out, ref, atol=1e-4, rtol=1e-4), max_err

    print("KERNEL_OK")
</pallas_src>

<mosaic_0001>
module attributes {stable_mosaic.version = 11 : i64} {
  func.func @transformer_block_kernel(%arg0: i32, %arg1: memref<1x8x32xf32, #tpu.memory_space<vmem>>, %arg2: memref<1x1x8x8xi32, #tpu.memory_space<vmem>>, %arg3: memref<1x32xf32, #tpu.memory_space<vmem>>, %arg4: memref<1x32xf32, #tpu.memory_space<vmem>>, %arg5: memref<32x32xf32, #tpu.memory_space<vmem>>, %arg6: memref<1x32xf32, #tpu.memory_space<vmem>>, %arg7: memref<32x32xf32, #tpu.memory_space<vmem>>, %arg8: memref<1x32xf32, #tpu.memory_space<vmem>>, %arg9: memref<32x32xf32, #tpu.memory_space<vmem>>, %arg10: memref<1x32xf32, #tpu.memory_space<vmem>>, %arg11: memref<32x32xf32, #tpu.memory_space<vmem>>, %arg12: memref<1x32xf32, #tpu.memory_space<vmem>>, %arg13: memref<1x32xf32, #tpu.memory_space<vmem>>, %arg14: memref<1x32xf32, #tpu.memory_space<vmem>>, %arg15: memref<32x128xf32, #tpu.memory_space<vmem>>, %arg16: memref<1x128xf32, #tpu.memory_space<vmem>>, %arg17: memref<128x32xf32, #tpu.memory_space<vmem>>, %arg18: memref<1x32xf32, #tpu.memory_space<vmem>>, %arg19: memref<1x8x32xf32, #tpu.memory_space<vmem>>) attributes {dimension_semantics = [#tpu.dimension_semantics<parallel>], iteration_bounds = array<i64: 2>, scalar_prefetch = 0 : i64, scratch_operands = 0 : i64, tpu.core_type = #tpu.core_type<tc>, window_params = [{transform_indices = @transform_0, window_bounds = array<i64: 1, 8, 32>}, {transform_indices = @transform_1, window_bounds = array<i64: 1, 1, 8, 8>}, {pipeline_mode = #tpu.pipeline_mode<synchronous>, transform_indices = @transform_2, window_bounds = array<i64: 1, 32>}, {pipeline_mode = #tpu.pipeline_mode<synchronous>, transform_indices = @transform_3, window_bounds = array<i64: 1, 32>}, {pipeline_mode = #tpu.pipeline_mode<synchronous>, transform_indices = @transform_4, window_bounds = array<i64: 32, 32>}, {pipeline_mode = #tpu.pipeline_mode<synchronous>, transform_indices = @transform_5, window_bounds = array<i64: 1, 32>}, {pipeline_mode = #tpu.pipeline_mode<synchronous>, transform_indices = @transform_6, window_bounds = array<i64: 32, 32>}, {pipeline_mode = #tpu.pipeline_mode<synchronous>, transform_indices = @transform_7, window_bounds = array<i64: 1, 32>}, {pipeline_mode = #tpu.pipeline_mode<synchronous>, transform_indices = @transform_8, window_bounds = array<i64: 32, 32>}, {pipeline_mode = #tpu.pipeline_mode<synchronous>, transform_indices = @transform_9, window_bounds = array<i64: 1, 32>}, {pipeline_mode = #tpu.pipeline_mode<synchronous>, transform_indices = @transform_10, window_bounds = array<i64: 32, 32>}, {pipeline_mode = #tpu.pipeline_mode<synchronous>, transform_indices = @transform_11, window_bounds = array<i64: 1, 32>}, {pipeline_mode = #tpu.pipeline_mode<synchronous>, transform_indices = @transform_12, window_bounds = array<i64: 1, 32>}, {pipeline_mode = #tpu.pipeline_mode<synchronous>, transform_indices = @transform_13, window_bounds = array<i64: 1, 32>}, {pipeline_mode = #tpu.pipeline_mode<synchronous>, transform_indices = @transform_14, window_bounds = array<i64: 32, 128>}, {pipeline_mode = #tpu.pipeline_mode<synchronous>, transform_indices = @transform_15, window_bounds = array<i64: 1, 128>}, {pipeline_mode = #tpu.pipeline_mode<synchronous>, transform_indices = @transform_16, window_bounds = array<i64: 128, 32>}, {pipeline_mode = #tpu.pipeline_mode<synchronous>, transform_indices = @transform_17, window_bounds = array<i64: 1, 32>}, {transform_indices = @transform_18, window_bounds = array<i64: 1, 8, 32>}]} {
    %c0 = arith.constant 0 : index
    %c0_0 = arith.constant 0 : index
    %c0_1 = arith.constant 0 : index
    %0 = vector.load %arg1[%c0, %c0_0, %c0_1] : memref<1x8x32xf32, #tpu.memory_space<vmem>>, vector<1x8x32xf32>
    %1 = vector.shape_cast %0 : vector<1x8x32xf32> to vector<8x32xf32>
    %c0_2 = arith.constant 0 : index
    %c0_3 = arith.constant 0 : index
    %c0_4 = arith.constant 0 : index
    %c0_5 = arith.constant 0 : index
    %2 = vector.load %arg2[%c0_2, %c0_3, %c0_4, %c0_5] : memref<1x1x8x8xi32, #tpu.memory_space<vmem>>, vector<1x1x8x8xi32>
    %3 = vector.shape_cast %2 : vector<1x1x8x8xi32> to vector<8x8xi32>
    %c0_6 = arith.constant 0 : index
    %c0_7 = arith.constant 0 : index
    %4 = vector.load %arg3[%c0_6, %c0_7] : memref<1x32xf32, #tpu.memory_space<vmem>>, vector<1x32xf32>
    %c0_8 = arith.constant 0 : index
    %c0_9 = arith.constant 0 : index
    %5 = vector.load %arg4[%c0_8, %c0_9] : memref<1x32xf32, #tpu.memory_space<vmem>>, vector<1x32xf32>
    %cst = arith.constant dense<0.000000e+00> : vector<8xf32>
    %6 = vector.multi_reduction <add>, %1, %cst [1] : vector<8x32xf32> to vector<8xf32>
    %7 = vector.shape_cast %6 : vector<8xf32> to vector<8x1xf32>
    %cst_10 = arith.constant 3.200000e+01 : f32
    %8 = vector.broadcast %cst_10 : f32 to vector<8x1xf32>
    %9 = arith.divf %7, %8 : vector<8x1xf32>
    %10 = vector.broadcast %9 : vector<8x1xf32> to vector<8x32xf32>
    %11 = arith.subf %1, %10 : vector<8x32xf32>
    %12 = arith.mulf %11, %11 : vector<8x32xf32>
    %cst_11 = arith.constant dense<0.000000e+00> : vector<8xf32>
    %13 = vector.multi_reduction <add>, %12, %cst_11 [1] : vector<8x32xf32> to vector<8xf32>
    %14 = vector.shape_cast %13 : vector<8xf32> to vector<8x1xf32>
    %cst_12 = arith.constant 0.0322580636 : f32
    %15 = vector.broadcast %cst_12 : f32 to vector<8x1xf32>
    %16 = arith.mulf %14, %15 : vector<8x1xf32>
    %17 = math.sqrt %16 : vector<8x1xf32>
    %cst_13 = arith.constant 9.99999997E-7 : f32
    %18 = vector.broadcast %cst_13 : f32 to vector<8x1xf32>
    %19 = arith.addf %17, %18 : vector<8x1xf32>
    %20 = tpu.reciprocal %19 : vector<8x1xf32> -> vector<8x1xf32>
    %21 = vector.broadcast %4 : vector<1x32xf32> to vector<8x32xf32>
    %22 = arith.mulf %21, %11 : vector<8x32xf32>
    %23 = vector.broadcast %20 : vector<8x1xf32> to vector<8x32xf32>
    %24 = arith.mulf %22, %23 : vector<8x32xf32>
    %25 = vector.broadcast %5 : vector<1x32xf32> to vector<8x32xf32>
    %26 = arith.addf %24, %25 : vector<8x32xf32>
    %c0_14 = arith.constant 0 : index
    %c0_15 = arith.constant 0 : index
    %27 = vector.load %arg5[%c0_14, %c0_15] : memref<32x32xf32, #tpu.memory_space<vmem>>, vector<32x32xf32>
    %cst_16 = arith.constant dense<0.000000e+00> : vector<8x32xf32>
    %28 = tpu.matmul %26, %27, %cst_16 {dimension_numbers = #tpu.dot_dimension_numbers<[1], [0], [0], [1], [0, 0, 1, 1], [], []>} : vector<8x32xf32>, vector<32x32xf32>, vector<8x32xf32> -> vector<8x32xf32>
    %c0_17 = arith.constant 0 : index
    %c0_18 = arith.constant 0 : index
    %29 = vector.load %arg6[%c0_17, %c0_18] : memref<1x32xf32, #tpu.memory_space<vmem>>, vector<1x32xf32>
    %30 = vector.broadcast %29 : vector<1x32xf32> to vector<8x32xf32>
    %31 = arith.addf %28, %30 : vector<8x32xf32>
    %c0_19 = arith.constant 0 : index
    %c0_20 = arith.constant 0 : index
    %32 = vector.load %arg7[%c0_19, %c0_20] : memref<32x32xf32, #tpu.memory_space<vmem>>, vector<32x32xf32>
    %cst_21 = arith.constant dense<0.000000e+00> : vector<8x32xf32>
    %33 = tpu.matmul %26, %32, %cst_21 {dimension_numbers = #tpu.dot_dimension_numbers<[1], [0], [0], [1], [0, 0, 1, 1], [], []>} : vector<8x32xf32>, vector<32x32xf32>, vector<8x32xf32> -> vector<8x32xf32>
    %c0_22 = arith.constant 0 : index
    %c0_23 = arith.constant 0 : index
    %34 = vector.load %arg8[%c0_22, %c0_23] : memref<1x32xf32, #tpu.memory_space<vmem>>, vector<1x32xf32>
    %35 = vector.broadcast %34 : vector<1x32xf32> to vector<8x32xf32>
    %36 = arith.addf %33, %35 : vector<8x32xf32>
    %c0_24 = arith.constant 0 : index
    %c0_25 = arith.constant 0 : index
    %37 = vector.load %arg9[%c0_24, %c0_25] : memref<32x32xf32, #tpu.memory_space<vmem>>, vector<32x32xf32>
    %cst_26 = arith.constant dense<0.000000e+00> : vector<8x32xf32>
    %38 = tpu.matmul %26, %37, %cst_26 {dimension_numbers = #tpu.dot_dimension_numbers<[1], [0], [0], [1], [0, 0, 1, 1], [], []>} : vector<8x32xf32>, vector<32x32xf32>, vector<8x32xf32> -> vector<8x32xf32>
    %c0_27 = arith.constant 0 : index
    %c0_28 = arith.constant 0 : index
    %39 = vector.load %arg10[%c0_27, %c0_28] : memref<1x32xf32, #tpu.memory_space<vmem>>, vector<1x32xf32>
    %40 = vector.broadcast %39 : vector<1x32xf32> to vector<8x32xf32>
    %41 = arith.addf %38, %40 : vector<8x32xf32>
    %cst_29 = arith.constant 0.000000e+00 : f32
    %42 = vector.broadcast %cst_29 : f32 to vector<8x32xf32>
    %43 = vector.extract_strided_slice %31 {offsets = [0, 0], sizes = [8, 8], strides = [1, 1]} : vector<8x32xf32> to vector<8x8xf32>
    %44 = vector.extract_strided_slice %36 {offsets = [0, 0], sizes = [8, 8], strides = [1, 1]} : vector<8x32xf32> to vector<8x8xf32>
    %45 = vector.extract_strided_slice %41 {offsets = [0, 0], sizes = [8, 8], strides = [1, 1]} : vector<8x32xf32> to vector<8x8xf32>
    %46 = tpu.transpose %44, [1, 0] : vector<8x8xf32> -> vector<8x8xf32>
    %cst_30 = arith.constant dense<0.000000e+00> : vector<8x8xf32>
    %47 = tpu.matmul %43, %46, %cst_30 {dimension_numbers = #tpu.dot_dimension_numbers<[1], [0], [0], [1], [0, 0, 1, 1], [], []>} : vector<8x8xf32>, vector<8x8xf32>, vector<8x8xf32> -> vector<8x8xf32>
    %cst_31 = arith.constant 0.353553385 : f32
    %48 = vector.broadcast %cst_31 : f32 to vector<8x8xf32>
    %49 = arith.mulf %47, %48 : vector<8x8xf32>
    %c0_i32 = arith.constant 0 : i32
    %50 = vector.broadcast %c0_i32 : i32 to vector<8x8xi32>
    %51 = arith.cmpi eq, %3, %50 : vector<8x8xi32>
    %cst_32 = arith.constant -1.000000e+09 : f32
    %52 = vector.broadcast %cst_32 : f32 to vector<8x8xf32>
    %53 = arith.select %51, %52, %49 : vector<8x8xi1>, vector<8x8xf32>
    %cst_33 = arith.constant dense<0xFF800000> : vector<8xf32>
    %54 = vector.multi_reduction <maximumf>, %53, %cst_33 [1] : vector<8x8xf32> to vector<8xf32>
    %55 = vector.shape_cast %54 : vector<8xf32> to vector<8x1xf32>
    %56 = vector.broadcast %55 : vector<8x1xf32> to vector<8x8xf32>
    %57 = arith.subf %53, %56 : vector<8x8xf32>
    %58 = math.exp %57 : vector<8x8xf32>
    %cst_34 = arith.constant dense<0.000000e+00> : vector<8xf32>
    %59 = vector.multi_reduction <add>, %58, %cst_34 [1] : vector<8x8xf32> to vector<8xf32>
    %60 = vector.shape_cast %59 : vector<8xf32> to vector<8x1xf32>
    %61 = tpu.reciprocal %60 : vector<8x1xf32> -> vector<8x1xf32>
    %62 = vector.broadcast %61 : vector<8x1xf32> to vector<8x8xf32>
    %63 = arith.mulf %58, %62 : vector<8x8xf32>
    %cst_35 = arith.constant dense<0.000000e+00> : vector<8x8xf32>
    %64 = tpu.matmul %63, %45, %cst_35 {dimension_numbers = #tpu.dot_dimension_numbers<[1], [0], [0], [1], [0, 0, 1, 1], [], []>} : vector<8x8xf32>, vector<8x8xf32>, vector<8x8xf32> -> vector<8x8xf32>
    %c0_36 = arith.constant 0 : index
    %c0_37 = arith.constant 0 : index
    %65 = vector.load %arg11[%c0_36, %c0_37] : memref<32x32xf32, #tpu.memory_space<vmem>>, vector<8x32xf32>
    %cst_38 = arith.constant dense<0.000000e+00> : vector<8x32xf32>
    %66 = tpu.matmul %64, %65, %cst_38 {dimension_numbers = #tpu.dot_dimension_numbers<[1], [0], [0], [1], [0, 0, 1, 1], [], []>} : vector<8x8xf32>, vector<8x32xf32>, vector<8x32xf32> -> vector<8x32xf32>
    %67 = arith.addf %42, %66 : vector<8x32xf32>
    %68 = vector.extract_strided_slice %31 {offsets = [0, 8], sizes = [8, 8], strides = [1, 1]} : vector<8x32xf32> to vector<8x8xf32>
    %69 = vector.extract_strided_slice %36 {offsets = [0, 8], sizes = [8, 8], strides = [1, 1]} : vector<8x32xf32> to vector<8x8xf32>
    %70 = vector.extract_strided_slice %41 {offsets = [0, 8], sizes = [8, 8], strides = [1, 1]} : vector<8x32xf32> to vector<8x8xf32>
    %71 = tpu.transpose %69, [1, 0] : vector<8x8xf32> -> vector<8x8xf32>
    %cst_39 = arith.constant dense<0.000000e+00> : vector<8x8xf32>
    %72 = tpu.matmul %68, %71, %cst_39 {dimension_numbers = #tpu.dot_dimension_numbers<[1], [0], [0], [1], [0, 0, 1, 1], [], []>} : vector<8x8xf32>, vector<8x8xf32>, vector<8x8xf32> -> vector<8x8xf32>
    %cst_40 = arith.constant 0.353553385 : f32
    %73 = vector.broadcast %cst_40 : f32 to vector<8x8xf32>
    %74 = arith.mulf %72, %73 : vector<8x8xf32>
    %c0_i32_41 = arith.constant 0 : i32
    %75 = vector.broadcast %c0_i32_41 : i32 to vector<8x8xi32>
    %76 = arith.cmpi eq, %3, %75 : vector<8x8xi32>
    %cst_42 = arith.constant -1.000000e+09 : f32
    %77 = vector.broadcast %cst_42 : f32 to vector<8x8xf32>
    %78 = arith.select %76, %77, %74 : vector<8x8xi1>, vector<8x8xf32>
    %cst_43 = arith.constant dense<0xFF800000> : vector<8xf32>
    %79 = vector.multi_reduction <maximumf>, %78, %cst_43 [1] : vector<8x8xf32> to vector<8xf32>
    %80 = vector.shape_cast %79 : vector<8xf32> to vector<8x1xf32>
    %81 = vector.broadcast %80 : vector<8x1xf32> to vector<8x8xf32>
    %82 = arith.subf %78, %81 : vector<8x8xf32>
    %83 = math.exp %82 : vector<8x8xf32>
    %cst_44 = arith.constant dense<0.000000e+00> : vector<8xf32>
    %84 = vector.multi_reduction <add>, %83, %cst_44 [1] : vector<8x8xf32> to vector<8xf32>
    %85 = vector.shape_cast %84 : vector<8xf32> to vector<8x1xf32>
    %86 = tpu.reciprocal %85 : vector<8x1xf32> -> vector<8x1xf32>
    %87 = vector.broadcast %86 : vector<8x1xf32> to vector<8x8xf32>
    %88 = arith.mulf %83, %87 : vector<8x8xf32>
    %cst_45 = arith.constant dense<0.000000e+00> : vector<8x8xf32>
    %89 = tpu.matmul %88, %70, %cst_45 {dimension_numbers = #tpu.dot_dimension_numbers<[1], [0], [0], [1], [0, 0, 1, 1], [], []>} : vector<8x8xf32>, vector<8x8xf32>, vector<8x8xf32> -> vector<8x8xf32>
    %c8 = arith.constant 8 : index
    %c0_46 = arith.constant 0 : index
    %90 = vector.load %arg11[%c8, %c0_46] : memref<32x32xf32, #tpu.memory_space<vmem>>, vector<8x32xf32>
    %cst_47 = arith.constant dense<0.000000e+00> : vector<8x32xf32>
    %91 = tpu.matmul %89, %90, %cst_47 {dimension_numbers = #tpu.dot_dimension_numbers<[1], [0], [0], [1], [0, 0, 1, 1], [], []>} : vector<8x8xf32>, vector<8x32xf32>, vector<8x32xf32> -> vector<8x32xf32>
    %92 = arith.addf %67, %91 : vector<8x32xf32>
    %93 = vector.extract_strided_slice %31 {offsets = [0, 16], sizes = [8, 8], strides = [1, 1]} : vector<8x32xf32> to vector<8x8xf32>
    %94 = vector.extract_strided_slice %36 {offsets = [0, 16], sizes = [8, 8], strides = [1, 1]} : vector<8x32xf32> to vector<8x8xf32>
    %95 = vector.extract_strided_slice %41 {offsets = [0, 16], sizes = [8, 8], strides = [1, 1]} : vector<8x32xf32> to vector<8x8xf32>
    %96 = tpu.transpose %94, [1, 0] : vector<8x8xf32> -> vector<8x8xf32>
    %cst_48 = arith.constant dense<0.000000e+00> : vector<8x8xf32>
    %97 = tpu.matmul %93, %96, %cst_48 {dimension_numbers = #tpu.dot_dimension_numbers<[1], [0], [0], [1], [0, 0, 1, 1], [], []>} : vector<8x8xf32>, vector<8x8xf32>, vector<8x8xf32> -> vector<8x8xf32>
    %cst_49 = arith.constant 0.353553385 : f32
    %98 = vector.broadcast %cst_49 : f32 to vector<8x8xf32>
    %99 = arith.mulf %97, %98 : vector<8x8xf32>
    %c0_i32_50 = arith.constant 0 : i32
    %100 = vector.broadcast %c0_i32_50 : i32 to vector<8x8xi32>
    %101 = arith.cmpi eq, %3, %100 : vector<8x8xi32>
    %cst_51 = arith.constant -1.000000e+09 : f32
    %102 = vector.broadcast %cst_51 : f32 to vector<8x8xf32>
    %103 = arith.select %101, %102, %99 : vector<8x8xi1>, vector<8x8xf32>
    %cst_52 = arith.constant dense<0xFF800000> : vector<8xf32>
    %104 = vector.multi_reduction <maximumf>, %103, %cst_52 [1] : vector<8x8xf32> to vector<8xf32>
    %105 = vector.shape_cast %104 : vector<8xf32> to vector<8x1xf32>
    %106 = vector.broadcast %105 : vector<8x1xf32> to vector<8x8xf32>
    %107 = arith.subf %103, %106 : vector<8x8xf32>
    %108 = math.exp %107 : vector<8x8xf32>
    %cst_53 = arith.constant dense<0.000000e+00> : vector<8xf32>
    %109 = vector.multi_reduction <add>, %108, %cst_53 [1] : vector<8x8xf32> to vector<8xf32>
    %110 = vector.shape_cast %109 : vector<8xf32> to vector<8x1xf32>
    %111 = tpu.reciprocal %110 : vector<8x1xf32> -> vector<8x1xf32>
    %112 = vector.broadcast %111 : vector<8x1xf32> to vector<8x8xf32>
    %113 = arith.mulf %108, %112 : vector<8x8xf32>
    %cst_54 = arith.constant dense<0.000000e+00> : vector<8x8xf32>
    %114 = tpu.matmul %113, %95, %cst_54 {dimension_numbers = #tpu.dot_dimension_numbers<[1], [0], [0], [1], [0, 0, 1, 1], [], []>} : vector<8x8xf32>, vector<8x8xf32>, vector<8x8xf32> -> vector<8x8xf32>
    %c16 = arith.constant 16 : index
    %c0_55 = arith.constant 0 : index
    %115 = vector.load %arg11[%c16, %c0_55] : memref<32x32xf32, #tpu.memory_space<vmem>>, vector<8x32xf32>
    %cst_56 = arith.constant dense<0.000000e+00> : vector<8x32xf32>
    %116 = tpu.matmul %114, %115, %cst_56 {dimension_numbers = #tpu.dot_dimension_numbers<[1], [0], [0], [1], [0, 0, 1, 1], [], []>} : vector<8x8xf32>, vector<8x32xf32>, vector<8x32xf32> -> vector<8x32xf32>
    %117 = arith.addf %92, %116 : vector<8x32xf32>
    %118 = vector.extract_strided_slice %31 {offsets = [0, 24], sizes = [8, 8], strides = [1, 1]} : vector<8x32xf32> to vector<8x8xf32>
    %119 = vector.extract_strided_slice %36 {offsets = [0, 24], sizes = [8, 8], strides = [1, 1]} : vector<8x32xf32> to vector<8x8xf32>
    %120 = vector.extract_strided_slice %41 {offsets = [0, 24], sizes = [8, 8], strides = [1, 1]} : vector<8x32xf32> to vector<8x8xf32>
    %121 = tpu.transpose %119, [1, 0] : vector<8x8xf32> -> vector<8x8xf32>
    %cst_57 = arith.constant dense<0.000000e+00> : vector<8x8xf32>
    %122 = tpu.matmul %118, %121, %cst_57 {dimension_numbers = #tpu.dot_dimension_numbers<[1], [0], [0], [1], [0, 0, 1, 1], [], []>} : vector<8x8xf32>, vector<8x8xf32>, vector<8x8xf32> -> vector<8x8xf32>
    %cst_58 = arith.constant 0.353553385 : f32
    %123 = vector.broadcast %cst_58 : f32 to vector<8x8xf32>
    %124 = arith.mulf %122, %123 : vector<8x8xf32>
    %c0_i32_59 = arith.constant 0 : i32
    %125 = vector.broadcast %c0_i32_59 : i32 to vector<8x8xi32>
    %126 = arith.cmpi eq, %3, %125 : vector<8x8xi32>
    %cst_60 = arith.constant -1.000000e+09 : f32
    %127 = vector.broadcast %cst_60 : f32 to vector<8x8xf32>
    %128 = arith.select %126, %127, %124 : vector<8x8xi1>, vector<8x8xf32>
    %cst_61 = arith.constant dense<0xFF800000> : vector<8xf32>
    %129 = vector.multi_reduction <maximumf>, %128, %cst_61 [1] : vector<8x8xf32> to vector<8xf32>
    %130 = vector.shape_cast %129 : vector<8xf32> to vector<8x1xf32>
    %131 = vector.broadcast %130 : vector<8x1xf32> to vector<8x8xf32>
    %132 = arith.subf %128, %131 : vector<8x8xf32>
    %133 = math.exp %132 : vector<8x8xf32>
    %cst_62 = arith.constant dense<0.000000e+00> : vector<8xf32>
    %134 = vector.multi_reduction <add>, %133, %cst_62 [1] : vector<8x8xf32> to vector<8xf32>
    %135 = vector.shape_cast %134 : vector<8xf32> to vector<8x1xf32>
    %136 = tpu.reciprocal %135 : vector<8x1xf32> -> vector<8x1xf32>
    %137 = vector.broadcast %136 : vector<8x1xf32> to vector<8x8xf32>
    %138 = arith.mulf %133, %137 : vector<8x8xf32>
    %cst_63 = arith.constant dense<0.000000e+00> : vector<8x8xf32>
    %139 = tpu.matmul %138, %120, %cst_63 {dimension_numbers = #tpu.dot_dimension_numbers<[1], [0], [0], [1], [0, 0, 1, 1], [], []>} : vector<8x8xf32>, vector<8x8xf32>, vector<8x8xf32> -> vector<8x8xf32>
    %c24 = arith.constant 24 : index
    %c0_64 = arith.constant 0 : index
    %140 = vector.load %arg11[%c24, %c0_64] : memref<32x32xf32, #tpu.memory_space<vmem>>, vector<8x32xf32>
    %cst_65 = arith.constant dense<0.000000e+00> : vector<8x32xf32>
    %141 = tpu.matmul %139, %140, %cst_65 {dimension_numbers = #tpu.dot_dimension_numbers<[1], [0], [0], [1], [0, 0, 1, 1], [], []>} : vector<8x8xf32>, vector<8x32xf32>, vector<8x32xf32> -> vector<8x32xf32>
    %142 = arith.addf %117, %141 : vector<8x32xf32>
    %143 = arith.addf %1, %142 : vector<8x32xf32>
    %c0_66 = arith.constant 0 : index
    %c0_67 = arith.constant 0 : index
    %144 = vector.load %arg12[%c0_66, %c0_67] : memref<1x32xf32, #tpu.memory_space<vmem>>, vector<1x32xf32>
    %145 = vector.broadcast %144 : vector<1x32xf32> to vector<8x32xf32>
    %146 = arith.addf %143, %145 : vector<8x32xf32>
    %c0_68 = arith.constant 0 : index
    %c0_69 = arith.constant 0 : index
    %147 = vector.load %arg13[%c0_68, %c0_69] : memref<1x32xf32, #tpu.memory_space<vmem>>, vector<1x32xf32>
    %c0_70 = arith.constant 0 : index
    %c0_71 = arith.constant 0 : index
    %148 = vector.load %arg14[%c0_70, %c0_71] : memref<1x32xf32, #tpu.memory_space<vmem>>, vector<1x32xf32>
    %cst_72 = arith.constant dense<0.000000e+00> : vector<8xf32>
    %149 = vector.multi_reduction <add>, %146, %cst_72 [1] : vector<8x32xf32> to vector<8xf32>
    %150 = vector.shape_cast %149 : vector<8xf32> to vector<8x1xf32>
    %cst_73 = arith.constant 3.200000e+01 : f32
    %151 = vector.broadcast %cst_73 : f32 to vector<8x1xf32>
    %152 = arith.divf %150, %151 : vector<8x1xf32>
    %153 = vector.broadcast %152 : vector<8x1xf32> to vector<8x32xf32>
    %154 = arith.subf %146, %153 : vector<8x32xf32>
    %155 = arith.mulf %154, %154 : vector<8x32xf32>
    %cst_74 = arith.constant dense<0.000000e+00> : vector<8xf32>
    %156 = vector.multi_reduction <add>, %155, %cst_74 [1] : vector<8x32xf32> to vector<8xf32>
    %157 = vector.shape_cast %156 : vector<8xf32> to vector<8x1xf32>
    %cst_75 = arith.constant 0.0322580636 : f32
    %158 = vector.broadcast %cst_75 : f32 to vector<8x1xf32>
    %159 = arith.mulf %157, %158 : vector<8x1xf32>
    %160 = math.sqrt %159 : vector<8x1xf32>
    %cst_76 = arith.constant 9.99999997E-7 : f32
    %161 = vector.broadcast %cst_76 : f32 to vector<8x1xf32>
    %162 = arith.addf %160, %161 : vector<8x1xf32>
    %163 = tpu.reciprocal %162 : vector<8x1xf32> -> vector<8x1xf32>
    %164 = vector.broadcast %147 : vector<1x32xf32> to vector<8x32xf32>
    %165 = arith.mulf %164, %154 : vector<8x32xf32>
    %166 = vector.broadcast %163 : vector<8x1xf32> to vector<8x32xf32>
    %167 = arith.mulf %165, %166 : vector<8x32xf32>
    %168 = vector.broadcast %148 : vector<1x32xf32> to vector<8x32xf32>
    %169 = arith.addf %167, %168 : vector<8x32xf32>
    %c0_77 = arith.constant 0 : index
    %c0_78 = arith.constant 0 : index
    %170 = vector.load %arg15[%c0_77, %c0_78] : memref<32x128xf32, #tpu.memory_space<vmem>>, vector<32x128xf32>
    %cst_79 = arith.constant dense<0.000000e+00> : vector<8x128xf32>
    %171 = tpu.matmul %169, %170, %cst_79 {dimension_numbers = #tpu.dot_dimension_numbers<[1], [0], [0], [1], [0, 0, 1, 1], [], []>} : vector<8x32xf32>, vector<32x128xf32>, vector<8x128xf32> -> vector<8x128xf32>
    %c0_80 = arith.constant 0 : index
    %c0_81 = arith.constant 0 : index
    %172 = vector.load %arg16[%c0_80, %c0_81] : memref<1x128xf32, #tpu.memory_space<vmem>>, vector<1x128xf32>
    %173 = vector.broadcast %172 : vector<1x128xf32> to vector<8x128xf32>
    %174 = arith.addf %171, %173 : vector<8x128xf32>
    %cst_82 = arith.constant 5.000000e-01 : f32
    %175 = vector.broadcast %cst_82 : f32 to vector<8x128xf32>
    %176 = arith.mulf %175, %174 : vector<8x128xf32>
    %cst_83 = arith.constant 4.471500e-02 : f32
    %177 = vector.broadcast %cst_83 : f32 to vector<8x128xf32>
    %178 = arith.mulf %177, %174 : vector<8x128xf32>
    %179 = arith.mulf %178, %174 : vector<8x128xf32>
    %180 = arith.mulf %179, %174 : vector<8x128xf32>
    %181 = arith.addf %174, %180 : vector<8x128xf32>
    %cst_84 = arith.constant 0.797884583 : f32
    %182 = vector.broadcast %cst_84 : f32 to vector<8x128xf32>
    %183 = arith.mulf %182, %181 : vector<8x128xf32>
    %184 = math.tanh %183 : vector<8x128xf32>
    %cst_85 = arith.constant 1.000000e+00 : f32
    %185 = vector.broadcast %cst_85 : f32 to vector<8x128xf32>
    %186 = arith.addf %185, %184 : vector<8x128xf32>
    %187 = arith.mulf %176, %186 : vector<8x128xf32>
    %c0_86 = arith.constant 0 : index
    %c0_87 = arith.constant 0 : index
    %188 = vector.load %arg17[%c0_86, %c0_87] : memref<128x32xf32, #tpu.memory_space<vmem>>, vector<128x32xf32>
    %cst_88 = arith.constant dense<0.000000e+00> : vector<8x32xf32>
    %189 = tpu.matmul %187, %188, %cst_88 {dimension_numbers = #tpu.dot_dimension_numbers<[1], [0], [0], [1], [0, 0, 1, 1], [], []>} : vector<8x128xf32>, vector<128x32xf32>, vector<8x32xf32> -> vector<8x32xf32>
    %c0_89 = arith.constant 0 : index
    %c0_90 = arith.constant 0 : index
    %190 = vector.load %arg18[%c0_89, %c0_90] : memref<1x32xf32, #tpu.memory_space<vmem>>, vector<1x32xf32>
    %191 = vector.broadcast %190 : vector<1x32xf32> to vector<8x32xf32>
    %192 = arith.addf %189, %191 : vector<8x32xf32>
    %193 = arith.addf %146, %192 : vector<8x32xf32>
    %c0_91 = arith.constant 0 : index
    %c0_92 = arith.constant 0 : index
    %c0_93 = arith.constant 0 : index
    %194 = vector.load %arg19[%c0_91, %c0_92, %c0_93] : memref<1x8x32xf32, #tpu.memory_space<vmem>>, vector<1x8x32xf32>
    %195 = vector.shape_cast %194 : vector<1x8x32xf32> to vector<8x32xf32>
    %196 = vector.shape_cast %193 : vector<8x32xf32> to vector<1x8x32xf32>
    tpu.vector_store %arg19[%c0_91, %c0_92, %c0_93], %196 {strides = array<i32>} : memref<1x8x32xf32, #tpu.memory_space<vmem>>, vector<1x8x32xf32>,
    return
  }
  func.func @transform_0(%arg0: i32) -> (i32, i32, i32) {
    %c0_i32 = arith.constant 0 : i32
    %c0_i32_0 = arith.constant 0 : i32
    %c0_i32_1 = arith.constant 0 : i32
    return %arg0, %c0_i32, %c0_i32_0 : i32, i32, i32
  }
  func.func @transform_1(%arg0: i32) -> (i32, i32, i32, i32) {
    %c0_i32 = arith.constant 0 : i32
    %c0_i32_0 = arith.constant 0 : i32
    %c0_i32_1 = arith.constant 0 : i32
    %c0_i32_2 = arith.constant 0 : i32
    return %arg0, %c0_i32, %c0_i32_0, %c0_i32_1 : i32, i32, i32, i32
  }
  func.func @transform_2(%arg0: i32) -> (i32, i32) {
    %c0_i32 = arith.constant 0 : i32
    %c0_i32_0 = arith.constant 0 : i32
    %c0_i32_1 = arith.constant 0 : i32
    return %c0_i32, %c0_i32_0 : i32, i32
  }
  func.func @transform_3(%arg0: i32) -> (i32, i32) {
    %c0_i32 = arith.constant 0 : i32
    %c0_i32_0 = arith.constant 0 : i32
    %c0_i32_1 = arith.constant 0 : i32
    return %c0_i32, %c0_i32_0 : i32, i32
  }
  func.func @transform_4(%arg0: i32) -> (i32, i32) {
    %c0_i32 = arith.constant 0 : i32
    %c0_i32_0 = arith.constant 0 : i32
    %c0_i32_1 = arith.constant 0 : i32
    return %c0_i32, %c0_i32_0 : i32, i32
  }
  func.func @transform_5(%arg0: i32) -> (i32, i32) {
    %c0_i32 = arith.constant 0 : i32
    %c0_i32_0 = arith.constant 0 : i32
    %c0_i32_1 = arith.constant 0 : i32
    return %c0_i32, %c0_i32_0 : i32, i32
  }
  func.func @transform_6(%arg0: i32) -> (i32, i32) {
    %c0_i32 = arith.constant 0 : i32
    %c0_i32_0 = arith.constant 0 : i32
    %c0_i32_1 = arith.constant 0 : i32
    return %c0_i32, %c0_i32_0 : i32, i32
  }
  func.func @transform_7(%arg0: i32) -> (i32, i32) {
    %c0_i32 = arith.constant 0 : i32
    %c0_i32_0 = arith.constant 0 : i32
    %c0_i32_1 = arith.constant 0 : i32
    return %c0_i32, %c0_i32_0 : i32, i32
  }
  func.func @transform_8(%arg0: i32) -> (i32, i32) {
    %c0_i32 = arith.constant 0 : i32
    %c0_i32_0 = arith.constant 0 : i32
    %c0_i32_1 = arith.constant 0 : i32
    return %c0_i32, %c0_i32_0 : i32, i32
  }
  func.func @transform_9(%arg0: i32) -> (i32, i32) {
    %c0_i32 = arith.constant 0 : i32
    %c0_i32_0 = arith.constant 0 : i32
    %c0_i32_1 = arith.constant 0 : i32
    return %c0_i32, %c0_i32_0 : i32, i32
  }
  func.func @transform_10(%arg0: i32) -> (i32, i32) {
    %c0_i32 = arith.constant 0 : i32
    %c0_i32_0 = arith.constant 0 : i32
    %c0_i32_1 = arith.constant 0 : i32
    return %c0_i32, %c0_i32_0 : i32, i32
  }
  func.func @transform_11(%arg0: i32) -> (i32, i32) {
    %c0_i32 = arith.constant 0 : i32
    %c0_i32_0 = arith.constant 0 : i32
    %c0_i32_1 = arith.constant 0 : i32
    return %c0_i32, %c0_i32_0 : i32, i32
  }
  func.func @transform_12(%arg0: i32) -> (i32, i32) {
    %c0_i32 = arith.constant 0 : i32
    %c0_i32_0 = arith.constant 0 : i32
    %c0_i32_1 = arith.constant 0 : i32
    return %c0_i32, %c0_i32_0 : i32, i32
  }
  func.func @transform_13(%arg0: i32) -> (i32, i32) {
    %c0_i32 = arith.constant 0 : i32
    %c0_i32_0 = arith.constant 0 : i32
    %c0_i32_1 = arith.constant 0 : i32
    return %c0_i32, %c0_i32_0 : i32, i32
  }
  func.func @transform_14(%arg0: i32) -> (i32, i32) {
    %c0_i32 = arith.constant 0 : i32
    %c0_i32_0 = arith.constant 0 : i32
    %c0_i32_1 = arith.constant 0 : i32
    return %c0_i32, %c0_i32_0 : i32, i32
  }
  func.func @transform_15(%arg0: i32) -> (i32, i32) {
    %c0_i32 = arith.constant 0 : i32
    %c0_i32_0 = arith.constant 0 : i32
    %c0_i32_1 = arith.constant 0 : i32
    return %c0_i32, %c0_i32_0 : i32, i32
  }
  func.func @transform_16(%arg0: i32) -> (i32, i32) {
    %c0_i32 = arith.constant 0 : i32
    %c0_i32_0 = arith.constant 0 : i32
    %c0_i32_1 = arith.constant 0 : i32
    return %c0_i32, %c0_i32_0 : i32, i32
  }
  func.func @transform_17(%arg0: i32) -> (i32, i32) {
    %c0_i32 = arith.constant 0 : i32
    %c0_i32_0 = arith.constant 0 : i32
    %c0_i32_1 = arith.constant 0 : i32
    return %c0_i32, %c0_i32_0 : i32, i32
  }
  func.func @transform_18(%arg0: i32) -> (i32, i32, i32) {
    %c0_i32 = arith.constant 0 : i32
    %c0_i32_0 = arith.constant 0 : i32
    %c0_i32_1 = arith.constant 0 : i32
    return %arg0, %c0_i32, %c0_i32_0 : i32, i32, i32
  }
}

</mosaic_0001>

<bundles_post_ra>
// kernel: tpu_custom_call.1
= control target key start
LH: loop header
LB: loop body
LE: loop exit
PB: predicated region body
PF: predicated region fallthrough
CT: control target
= control target key end

     0   :  { %s2251_s0 = inlined_call_operand.hbm [shape: f32[2,8,32], index: 0, kind: input, shape index: {}]   ;;  %s2252_s1 = inlined_call_operand.hbm [shape: s32[2,1,8,8], index: 1, kind: input, shape index: {}]   ;;  %s2253_s2 = inlined_call_operand.vmem [shape: f32[1,32], index: 2, kind: input, shape index: {}]   ;;  %s2254_s3 = inlined_call_operand.hbm [shape: f32[1,32], index: 3, kind: input, shape index: {}]   ;;  %s2255_s4 = inlined_call_operand.vmem [shape: f32[32,32], index: 4, kind: input, shape index: {}]   ;;  %s2256_s5 = inlined_call_operand.vmem [shape: f32[1,32], index: 5, kind: input, shape index: {}]   ;;  %s2257_s6 = inlined_call_operand.vmem [shape: f32[32,32], index: 6, kind: input, shape index: {}]   ;;  %s2258_s7 = inlined_call_operand.vmem [shape: f32[1,32], index: 7, kind: input, shape index: {}]   ;;  %s2259_s8 = inlined_call_operand.vmem [shape: f32[32,32], index: 8, kind: input, shape index: {}]   ;;  %s2260_s9 = inlined_call_operand.vmem [shape: f32[1,32], index: 9, kind: input, shape index: {}]   ;;  %s2261_s10 = inlined_call_operand.vmem [shape: f32[32,32], index: 10, kind: input, shape index: {}]   ;;  %s2262_s11 = inlined_call_operand.vmem [shape: f32[1,32], index: 11, kind: input, shape index: {}]   ;;  %s2263_s12 = inlined_call_operand.vmem [shape: f32[1,32], index: 12, kind: input, shape index: {}]   ;;  %s2264_s13 = inlined_call_operand.vmem [shape: f32[1,32], index: 13, kind: input, shape index: {}]   ;;  %s2265_s14 = inlined_call_operand.vmem [shape: f32[32,128], index: 14, kind: input, shape index: {}]   ;;  %s2266_s15 = inlined_call_operand.vmem [shape: f32[1,128], index: 15, kind: input, shape index: {}]   ;;  %s2267_s16 = inlined_call_operand.vmem [shape: f32[128,32], index: 16, kind: input, shape index: {}]   ;;  %s2268_s17 = inlined_call_operand.vmem [shape: f32[1,32], index: 17, kind: input, shape index: {}]   ;;  %s2269_s18 = inlined_call_operand.hbm [shape: f32[2,8,32], index: 18, kind: output, shape index: {}]  }
   0x1   :  { %2283 = sst [smem:[#allocation20_spill]] %s2251_s0 }
   0x2   :  { %2284 = sst [smem:[#allocation21_spill]] %s2252_s1 }
   0x3   :  { %2285 = sst [smem:[#allocation22_spill]] %s2253_s2 }
   0x4   :  { %2286 = sst [smem:[#allocation23_spill]] %s2254_s3 }
   0x5   :  { %2287 = sst [smem:[#allocation24_spill]] %s2262_s11 }
   0x6   :  { %2288 = sst [smem:[#allocation25_spill]] %s2263_s12 }
   0x7   :  { %2289 = sst [smem:[#allocation26_spill]] %s2264_s13 }
   0x8   :  { %2290 = sst [smem:[#allocation27_spill]] %s2265_s14 }
   0x9   :  { %2291 = sst [smem:[#allocation28_spill]] %s2266_s15 }
   0xa   :  { %2292 = sst [smem:[#allocation29_spill]] %s2267_s16 }
   0xb   :  { %2293 = sst [smem:[#allocation30_spill]] %s2268_s17 }
   0xc   :  { %2294 = sst [smem:[#allocation31_spill]] %s2269_s18 }
   0xd   :  { %23 = vsyncpa [#allocation3], 0 }
   0xe   :  { %25 = vsyncpa [#allocation3 + $0x1], 0 }
   0xf   :  { %26 = vsyncpa [#allocation6], 0 }
  0x10   :  { %28 = vsyncpa [#allocation6 + $0x1], 0 }
  0x11   :  { %29 = vsyncpa [#allocation4], 0 }
  0x12   :  { %31 = vsyncpa [#allocation4 + $0x1], 0  ;;  %s1868_s27 = smov 0   ;;  %s1870_s28 = smov 0  }
  0x13   :  { %s1872_s29 = smov 0   ;;  %s1874_s30 = smov 0  }
  0x14 LB: > { %2295 = sst [smem:[#allocation13_spill]] %s1754_s27  ;;  %s1889_s0 = sadd.s32 4294967295, %s1766_s30   ;;  %s1766_s30 = sphi %s1874_s30, %s2325_s30   ;;  %s1762_s29 = sphi %s1872_s29, %s2327_s29   ;;  %s1758_s28 = sphi %s1870_s28, %s2329_s28   ;;  %s1754_s27 = sphi %s1868_s27, %s2328_s27  }
  0x15   : > { %2296 = sst [smem:[#allocation14_spill]] %s1762_s29  ;;  %s1461_s19 = sadd.s32 4294967294, %s1766_s30  }
  0x16   : > { %2297 = sst [smem:[#allocation15_spill]] %s1766_s30  ;;  %p57_p0 = scmp.ne.s32.totalorder %s1758_s28, %s1754_s27 }
  0x17   : > { %p58_p1 = scmp.eq.s32.totalorder %s1889_s0, 0  ;;  %p443_p2 = scmp.eq.s32.totalorder %s1889_s0, 1 }
  0x18   : > { %p449_p3 = scmp.eq.s32.totalorder %s1461_s19, 1  ;;  %p1462_p5 = scmp.ge.s32.totalorder %s1766_s30, 1 }
  0x19   : > { %p1898_p4 = por %p58_p1, %p57_p0  ;;  %p456_p7 = scmp.lt.s32.totalorder %s1766_s30, 3 }
  0x1a   : > { %p1903_p6 = por %p449_p3, %p57_p0  ;;  %s2301_s3 = sld [smem:[#allocation23_spill]] }
  0x1b   : > { %p1911_p8 = pnand %p1462_p5, %p456_p7  ;;  %s1768_s24 = smov [#allocation7]  }
  0x1c   : > { %s2299_s20 = scalar_select %p1903_p6, 1, 0 }
  0x1d   : > { %p1508_p10 = pneg %p1911_p8  ;;  %s473_s25 = sshll.u32 %s1768_s24, 4  ;;  %s474_s25 = int_to_ptr.vmem [resolvable:$true] %s473_s25 }
  0x1e   : > { %2300 = sst [smem:[#allocation16_spill]] %s2299_s20  ;;  %s1921_s26 = sadd.s32 1, %s1766_s30  }
  0x1f   : > { %p1509_p11 = pnand %p1508_p10, %p58_p1  ;;  %2303 = sst [smem:[#allocation17_spill]] %s1921_s26 }
  0x20   : > { %s471_s2 = sshll.u32 %s2301_s3, 4  ;;  %s44_s19 = sadd.s32 1, %s1762_s29  ;;  %s472_s2 = int_to_ptr.hbm [resolvable:$true] %s471_s2 }
  0x21   : > { %s41_s21 = ssub.s32 %s1766_s30, %s1921_s26  ;;  %p51_p13 = scmp.ne.s32.totalorder %s1762_s29, %s1758_s28 }
  0x22   : > { %1511 = dma.hbm_to_vmem [thread:$0]  (!%p1509_p11), %s472_s2, 16, %s474_s25, [#allocation6]  }
  0x23   : > { %p42_p12 = scmp.eq.s32.totalorder %s41_s21, 0  ;;  %p52_p0 = scmp.eq.s32.totalorder %s1766_s30, 0 }
  0x24   : > { %p1524_p3 = scmp.lt.s32.totalorder %s1766_s30, 2  ;;  %p1935_p7 = por %p443_p2, %p51_p13 }
  0x25   : > { %s1931_s22 = scalar_select %p42_p12, %s1762_s29, %s44_s19  }
  0x26   : > { %p53_p5 = por %p52_p0, %p51_p13  ;;  %s526_s3 = sand.u32 1, %s1762_s29  }
  0x27   : > { %2304 = sst [smem:[#allocation18_spill]] %s1931_s22  ;;  %s1466_s20 = sshll.u32 %s1766_s30, 3 }
  0x28   : > { %s2305_s24 = scalar_select %p1935_p7, 1, 0 }
  0x29   : > { %s1465_s27 = sshll.u32 %s526_s3, 3  ;;  %s2307_s2 = sld [smem:[#allocation20_spill]] }
  0x2a   : > { %2306 = sst [smem:[#allocation19_spill]] %s2305_s24  ;;  %s530_s17 = scalar_lea.vmem [#allocation2], %s1465_s27 }
  0x2b   : > { %s538_s15 = sshll.u32 %s530_s17, 4  ;;  %p1946_p10 = pnand %p1524_p3, %p53_p5  ;;  %s539_s15 = int_to_ptr.vmem [resolvable:$true] %s538_s15 }
  0x2c   : > { %s2309_s24 = sld [smem:[#allocation21_spill]]  ;;  %s545_s12 = sand.u32 1, %s1766_s30  }
  0x2d   : > { %s527_s16 = scalar_lea.sflag [#allocation3], %s526_s3  ;;  %p1636_p11 = pneg %p1946_p10 }
  0x2f   : > { %s534_s25 = scalar_lea.hbm %s2307_s2, %s1466_s20  ;;  %s1639_s14 = scalar_lea.hbm %s2307_s2, 16 }
  0x30   : > { %s536_s21 = sshll.u32 %s534_s25, 4  ;;  %s537_s21 = int_to_ptr.hbm [resolvable:$true] %s536_s21 }
  0x31   : > { %s1632_s18 = sshra.s32 %s537_s21, 4  ;;  %s1633_s18 = int_to_ptr.hbm [resolvable:$true] %s1632_s18 }
  0x32   : > { %s553_s29 = scalar_lea.hbm %s2309_s24, %s1466_s20  ;;  %s1634_s26 = scalar_lea.hbm %s1633_s18, 8 }
  0x33   : > { %p1635_p2 = scmp.ne.s32.totalorder %s1633_s18, %s1634_s26  ;;  %p1640_p0 = scmp.lt.s32.totalorder %s1633_s18, %s2307_s2 }
  0x34   : > { %p1641_p3 = scmp.lt.s32.totalorder %s1639_s14, %s1634_s26 }
  0x35   : > { %p1637_p12 = pnand %p1636_p11, %p1635_p2 }
  0x36   : > { %p1642_p5 = por %p1641_p3, %p1640_p0 }
  0x37   : > { %p1638_p13 = pneg %p1637_p12 }
  0x39   : > { %p1643_p9 = pnand %p1642_p5, %p1638_p13 }
  0x3b   : > { %1646 = shalt.err (!%p1643_p9)
}
  0x3c   : > { %1515 = dma.hbm_to_vmem [thread:$0]  (!%p1946_p10), %s537_s21, 128, %s539_s15, %s527_s16  }
  0x3d   : > { %s555_s3 = sshll.u32 %s553_s29, 4  ;;  %s549_s20 = scalar_lea.vmem [#allocation5], %s1465_s27  ;;  %s556_s3 = int_to_ptr.hbm [resolvable:$true] %s555_s3 }
  0x3e   : > { %s557_s30 = sshll.u32 %s549_s20, 4  ;;  %s546_s11 = scalar_lea.sflag [#allocation6], %s545_s12  ;;  %s558_s30 = int_to_ptr.vmem [resolvable:$true] %s557_s30 }
  0x3f   : > { %s1662_s17 = sshra.s32 %s556_s3, 4  ;;  %s1669_s26 = scalar_lea.hbm %s2309_s24, 16  ;;  %s1663_s17 = int_to_ptr.hbm [resolvable:$true] %s1662_s17 }
  0x40   : > { %s1664_s25 = scalar_lea.hbm %s1663_s17, 8  ;;  %p1670_p9 = scmp.lt.s32.totalorder %s1663_s17, %s2309_s24 }
  0x41   : > { %p1665_p2 = scmp.ne.s32.totalorder %s1663_s17, %s1664_s25  ;;  %p1671_p13 = scmp.lt.s32.totalorder %s1669_s26, %s1664_s25 }
  0x43   : > { %p1667_p12 = pnand %p1665_p2, %p1636_p11  ;;  %p1672_p3 = por %p1671_p13, %p1670_p9 }
  0x45   : > { %p1668_p0 = pneg %p1667_p12 }
  0x47   : > { %p1673_p5 = pnand %p1672_p3, %p1668_p0 }
  0x49   : > { %1676 = shalt.err (!%p1673_p5)
}
  0x4a   : > { %1518 = dma.hbm_to_vmem [thread:$0]  (!%p1946_p10), %s556_s3, 128, %s558_s30, %s546_s11  }
  0x4b   : > { %566 = sbr.rel (%p1911_p8) target bundleno = 1885 (0x75d), region = 92  ;;  %s1981_s12 = sand.u32 (!%p1911_p8), 1, %s1758_s28  }
  0x4c   : > { %s1984_s16 = sshll.u32 (!%p1911_p8), %s1981_s12, 3  ;;  %s569_s27 = scalar_lea.sflag (!%p1911_p8), [#allocation3], %s1981_s12 }
  0x4d   : > { %s572_s29 = scalar_lea.vmem (!%p1911_p8), [#allocation2], %s1984_s16 }
  0x50   : > { %1737 = dma.done.wait (%p1898_p4), %s569_s27, 128  }
  0x51   : > { %1739 = vsyncadd (%p1898_p4), %s569_s27, 4294967168  ;;  %s578_s11 = sand.u32 1, %s1889_s0   ;;  %s582_s23 = scalar_lea.vmem [#allocation5], %s1984_s16 }
  0x52   : > { %s579_s30 = scalar_lea.sflag [#allocation6], %s578_s11 }
  0x53   : > { %1741 = dma.done.wait (%p1898_p4), %s579_s30, 128  }
  0x54   : > { %1743 = vsyncadd (%p1898_p4), %s579_s30, 4294967168 }
  0x55   : > { %1745 = dma.done.wait (%p58_p1), [#allocation6], 16  }
  0x56   : > { %1747 = vsyncadd (%p58_p1), [#allocation6], 4294967280  ;;  %vm650_vm0 = vcmask 261120   ;;  %v2002_v0 = vld [vmem:[%s572_s29] sm:$0xff]  ;;  %v1769_v2 = vmov 32.0   ;;  %v707_v14 = vld [vmem:[%s2255_s4 + $0x18] sm:$0xff] }
  0x57   : > { %v651_v1 = vsel %vm650_vm0, %v2002_v0, 0.0  ;;  %1574 = vrcp.f32 %v1769_v2  ;;  %v738_v15 = vld [vmem:[%s2257_s6 + $0x18] sm:$0xff]  ;;  %727 = vmatpush.msra.mxu0 %v707_v14  ;;  %v706_v17 = vld [vmem:[%s2255_s4 + $0x10] sm:$0xff]  ;;  %v705_v20 = vld [vmem:[%s2255_s4 + $0x8] sm:$0xff]  ;;  %s2310_s18 = sld [smem:[#allocation22_spill]]  ;;  %vm791_vm8 = vcmask 64512  }
  0x58   : > { %652 = vadd.xlane.f32.xlu0 %v651_v1  ;;  %v766_v16 = vld [vmem:[%s2259_s8 + $0x18] sm:$0xff]  ;;  %755 = vmatpush.msra.mxu1 %v738_v15  ;;  %v737_v18 = vld [vmem:[%s2257_s6 + $0x10] sm:$0xff]  ;;  %v736_v21 = vld [vmem:[%s2257_s6 + $0x8] sm:$0xff]  ;;  %s1770_s29 = smov 112   ;;  %s1771_s11 = smov 120  }
  0x59   : > { %v765_v19 = vld [vmem:[%s2259_s8 + $0x10] sm:$0xff]  ;;  %783 = vmatpush.msra.mxu2 %v766_v16  ;;  %728 = vmatpush.msra.mxu0 %v706_v17  ;;  %v764_v22 = vld [vmem:[%s2259_s8 + $0x8] sm:$0xff]  ;;  %v704_v23 = vld [vmem:[%s2255_s4] sm:$0xff]  ;;  %s1772_s21 = smov 104   ;;  %s2311_s13 = sld [smem:[#allocation24_spill]] }
  0x5a   : > { %756 = vmatpush.msra.mxu1 %v737_v18  ;;  %v735_v24 = vld [vmem:[%s2257_s6] sm:$0xff]  ;;  %s2314_s17 = sld [smem:[#allocation29_spill]]  ;;  %s645_s25 = scalar_lea.vmem [#allocation8], %s1984_s16 }
  0x5b   : > { %784 = vmatpush.msra.mxu2 %v765_v19  ;;  %729 = vmatpush.msra.mxu0 %v705_v20  ;;  %v763_v25 = vld [vmem:[%s2259_s8] sm:$0xff]  ;;  %s2315_s30 = sld [smem:[#allocation25_spill]]  ;;  %s1356_s14 = sshll.u32 %s645_s25, 4  ;;  %s1357_s14 = int_to_ptr.vmem [resolvable:$true] %s1356_s14 }
  0x5c   : > { %757 = vmatpush.msra.mxu1 %v736_v21  ;;  %v1565_v50 = vld [vmem:[#allocation7] ss:$0 sm:$0xff]  ;;  %s2317_s27 = sld [smem:[#allocation28_spill]] }
  0x5d   : > { %v1575_v3 = vpop.eup %1574  ;;  %785 = vmatpush.msra.mxu2 %v764_v22  ;;  %730 = vmatpush.msra.mxu0 %v704_v23  ;;  %v1564_v43 = vld [vmem:[%s2310_s18] ss:$0 sm:$0xff]  ;;  %s2319_s22 = sld [smem:[#allocation31_spill]] }
  0x5e   : > { %v655_v4 = vmul.f32 32.0, %v1575_v3  ;;  %vm659_vm1 = vweird.f32 %v1575_v3  ;;  %758 = vmatpush.msra.mxu1 %v735_v24  ;;  %v1566_v54 = vld [vmem:[%s2256_s5] ss:$0 sm:$0xff] }
  0x5f   : > { %786 = vmatpush.msra.mxu2 %v763_v25  ;;  %v1567_v55 = vld [vmem:[%s2258_s7] ss:$0 sm:$0xff] }
  0x60   : > { %v656_v5 = vsub.f32 1.0, %v655_v4  ;;  %v1568_v60 = vld [vmem:[%s2260_s9] ss:$0 sm:$0xff]  ;;  %v647_v4 = vld [vmem:[%s582_s23] sm:$0xff]  ;;  %s2316_s23 = sld [smem:[#allocation26_spill]] }
  0x61   : > { %vm819_vm9 = vcmp.eq.s32.totalorder %v647_v4, 0 }
  0x62   : > { %v657_v6 = vmul.f32 %v1575_v3, %v656_v5 }
  0x63   : > { %s1712_s16 = scalar_lea.hbm %s2319_s22, 16 }
  0x64   : > { %v658_v7 = vadd.f32 %v1575_v3, %v657_v6 }
  0x66   : > { %v2006_v8 = vsel %vm659_vm1, %v1575_v3, %v658_v7 }
  0xcb   : > { %v653_v9 = vpop.xlane.xlu0 %652 }
  0xcc   : > { %v661_v10 = vmul.f32 %v2006_v8, %v653_v9 }
  0xce   : > { %v662_v11 = vsub.f32 %v2002_v0, %v661_v10 }
  0xd0   : > { %v663_v12 = vmul.f32 %v662_v11, %v662_v11  ;;  %v698_v48 = vmul.f32 %v1564_v43, %v662_v11 }
  0xd2   : > { %v664_v13 = vsel %vm650_vm0, %v663_v12, 0.0 }
  0xd3   : > { %665 = vadd.xlane.f32.xlu0 %v664_v13 }
 0x146   : > { %v666_v26 = vpop.xlane.xlu0 %665 }
 0x147   : > { %v667_v27 = vmul.f32 0.032258064, %v666_v26 }
 0x149   : > { %1576 = vrsqrt.f32 %v667_v27  ;;  %vm675_vm2 = vcmp.eq.f32.partialorder %v667_v27, inf  ;;  %v678_v35 = vand.u32 2147483648, %v667_v27  ;;  %vm677_vm3 = vcmp.eq.f32.partialorder %v667_v27, 0.0 }
 0x14f   : > { %v1577_v28 = vpop.eup %1576 }
 0x150   : > { %v669_v29 = vmul.f32 %v1577_v28, %v667_v27 }
 0x152   : > { %v670_v30 = vmul.f32 %v1577_v28, %v669_v29 }
 0x154   : > { %v671_v31 = vmul.f32 0.5, %v670_v30 }
 0x156   : > { %v672_v32 = vsub.f32 1.5, %v671_v31 }
 0x158   : > { %v673_v33 = vmul.f32 %v1577_v28, %v672_v32 }
 0x15a   : > { %v674_v34 = vmul.f32 %v673_v33, %v667_v27 }
 0x15c   : > { %v676_v36 = vsel %vm675_vm2, %v667_v27, %v674_v34 }
 0x15d   : > { %v679_v37 = vsel %vm677_vm3, %v678_v35, %v676_v36 }
 0x15e   : > { %v680_v38 = vadd.f32 1e-06, %v679_v37 }
 0x160   : > { %1578 = vrcp.f32 %v680_v38  ;;  %v692_v42 = vand.u32 2147483648, %v680_v38  ;;  %v690_v45 = vand.u32 2147483647, %v680_v38  ;;  %vm686_vm5 = vweird.f32 %v680_v38 }
 0x162   : > { %v693_v47 = vor.u32 1.1754944e-38, %v692_v42  ;;  %vm691_vm7 = vcmp.eq.f32.partialorder %v690_v45, 8.507059e+37 }
 0x166   : > { %v1579_v39 = vpop.eup %1578 }
 0x167   : > { %v682_v40 = vmul.f32 %v1579_v39, %v680_v38  ;;  %vm687_vm4 = vweird.f32 %v1579_v39 }
 0x168   : > { %vm688_vm6 = vmor %vm686_vm5, %vm687_vm4 }
 0x169   : > { %v683_v41 = vsub.f32 1.0, %v682_v40 }
 0x16b   : > { %v684_v44 = vmul.f32 %v1579_v39, %v683_v41 }
 0x16d   : > { %v685_v46 = vadd.f32 %v1579_v39, %v684_v44 }
 0x16f   : > { %v689_v49 = vsel %vm688_vm6, %v1579_v39, %v685_v46 }
 0x170   : > { %v694_v51 = vsel %vm691_vm7, %v693_v47, %v689_v49 }
 0x171   : > { %v699_v52 = vmul.f32 %v698_v48, %v694_v51 }
 0x173   : > { %v703_v53 = vadd.f32 %v1565_v50, %v699_v52 }
 0x175   : > { %1474 = vmatmul.msk.f32.vlgmr.msra.gmra.mxu0 %vm650_vm0, %v703_v53  ;;  %1475 = vmatmul.msk.f32.vlgmr.msra.gmra.mxu1 %vm650_vm0, %v703_v53 }
 0x176   : > { %1476 = vmatmul.msk.f32.vlgmr.msra.gmra.mxu2 %vm650_vm0, %v703_v53 }
 0x1f2   : > { %v732_v56 = vpop.f32.mrf.mxu0  ;;  %v760_v57 = vpop.f32.mrf.mxu1 }
 0x1f3   : > { %v733_v58 = vadd.f32 %v1566_v54, %v732_v56  ;;  %v761_v59 = vadd.f32 %v1567_v55, %v760_v57 }
 0x1f5   : > { %999 = vrot.lane.b32.xlu2 %v761_v59, %s1770_s29  ;;  %871 = vrot.lane.b32.xlu1 %v761_v59, %s1771_s11 }
 0x1f6   : > { %1477 = vmatpush.xpose.msk.msrb.mxu0 %vm791_vm8, %v761_v59  ;;  %997 = vrot.lane.b32.xlu0 %v733_v58, %s1770_s29 }
 0x1f9   : > { %v788_v61 = vpop.f32.mrf.mxu2  ;;  %1478 = vmatmul.msk.f32.vlgmr.msrb.gmra.mxu0 %vm791_vm8, %v733_v58 }
 0x1fa   : > { %v2067_v62 = vadd.f32 %v1568_v60, %v788_v61 }
 0x1fc   : > { %863 = vmatpush.msrb.mxu1 %v2067_v62 }
 0x1fd   : > { %1104 = vrot.lane.b32.xlu2 %v761_v59, %s1772_s21  ;;  %869 = vrot.lane.b32.xlu1 %v733_v58, %s1771_s11 }
 0x205   : > { %1102 = vrot.lane.b32.xlu1 %v733_v58, %s1772_s21 }
 0x24f   : > { %v1000_v63 = vpop.permute.xlu2 %999 }
 0x257   : > { %v1105_v1 = vpop.permute.xlu2 %1104 }
 0x258   : > { %1489 = vmatpush.xpose.msk.msra.mxu3 %vm791_vm8, %v1105_v1 }
 0x267   : > { %v872_v2 = vpop.permute.xlu1 %871 }
 0x268   : > { %1480 = vmatpush.xpose.msk.msra.mxu0 %vm791_vm8, %v872_v2  ;;  %v998_v6 = vpop.permute.xlu0 %997 }
 0x26c   : > { %1485 = vmatpush.xpose.msk.msrb.mxu0 %vm791_vm8, %v1000_v63 }
 0x26f   : > { %v870_v3 = vpop.permute.xlu1 %869 }
 0x270   : > { %1481 = vmatmul.msk.f32.vlgmr.msra.gmra.mxu0 %vm791_vm8, %v870_v3 }
 0x276   : > { %v815_v5 = vpop.f32.mrf.mxu0 }
 0x277   : > { %v818_v7 = vmul.f32 0.35355338, %v815_v5  ;;  %v1103_v9 = vpop.permute.xlu1 %1102 }
 0x278   : > { %1486 = vmatmul.msk.f32.vlgmr.msrb.gmra.mxu0 %vm791_vm8, %v998_v6  ;;  %1490 = vmatmul.msk.f32.vlgmr.msra.gmra.mxu3 %vm791_vm8, %v1103_v9 }
 0x279   : > { %v820_v10 = vsel %vm819_vm9, -1e+09, %v818_v7 }
 0x27a   : > { %v821_v11 = vsel %vm791_vm8, %v820_v10, -inf }
 0x27b   : > { %822 = vmax.xlane.f32.xlu2 %v821_v11 }
 0x2ed   : > { %v894_v12 = vpop.f32.mrf.mxu0 }
 0x2ee   : > { %v897_v13 = vmul.f32 0.35355338, %v894_v12  ;;  %v823_v16 = vpop.xlane.xlu2 %822 }
 0x2ef   : > { %v824_v18 = vsub.f32 %v820_v10, %v823_v16 }
 0x2f0   : > { %v898_v14 = vsel %vm819_vm9, -1e+09, %v897_v13 }
 0x2f1   : > { %v899_v15 = vsel %vm791_vm8, %v898_v14, -inf  ;;  %v825_v22 = vmul.f32 1.442695, %v824_v18 }
 0x2f2   : > { %900 = vmax.xlane.f32.xlu1 %v899_v15 }
 0x2f3   : > { %1580 = vpow2.f32 %v825_v22 }
 0x2f5   : > { %v1022_v17 = vpop.f32.mrf.mxu0 }
 0x2f6   : > { %v1025_v19 = vmul.f32 0.35355338, %v1022_v17 }
 0x2f8   : > { %v1026_v20 = vsel %vm819_vm9, -1e+09, %v1025_v19 }
 0x2f9   : > { %v1027_v21 = vsel %vm791_vm8, %v1026_v20, -inf  ;;  %v1581_v27 = vpop.eup %1580 }
 0x2fa   : > { %1028 = vmax.xlane.f32.xlu0 %v1027_v21  ;;  %v827_v28 = vsel %vm791_vm8, %v1581_v27, 0.0 }
 0x2fb   : > { %v1127_v23 = vpop.f32.mrf.mxu3 }
 0x2fc   : > { %v1130_v24 = vmul.f32 0.35355338, %v1127_v23 }
 0x2fe   : > { %v1131_v25 = vsel %vm819_vm9, -1e+09, %v1130_v24 }
 0x2ff   : > { %v1132_v26 = vsel %vm791_vm8, %v1131_v25, -inf }
 0x300   : > { %1133 = vmax.xlane.f32.xlu2 %v1132_v26 }
 0x308   : > { %828 = vadd.xlane.f32.xlu2 %v827_v28 }
 0x365   : > { %v901_v29 = vpop.xlane.xlu1 %900 }
 0x366   : > { %v902_v30 = vsub.f32 %v898_v14, %v901_v29 }
 0x368   : > { %v903_v31 = vmul.f32 1.442695, %v902_v30 }
 0x36a   : > { %1582 = vpow2.f32 %v903_v31 }
 0x36d   : > { %v1029_v32 = vpop.xlane.xlu0 %1028 }
 0x36e   : > { %v1030_v33 = vsub.f32 %v1026_v20, %v1029_v32 }
 0x370   : > { %v2090_v34 = vpop.eup %1582  ;;  %v1031_v35 = vmul.f32 1.442695, %v1030_v33  ;;  %v950_v33 = vld [vmem:[%s2261_s10 + $0x8] sm:$0xff] }
 0x371   : > { %v905_v36 = vsel %vm791_vm8, %v2090_v34, 0.0  ;;  %969 = vmatpush.msrb.mxu2 %v950_v33  ;;  %v1308_v33 = vld [vmem:[%s2314_s17 + $0x38] sm:$0xff] }
 0x372   : > { %1584 = vpow2.f32 %v1031_v35  ;;  %906 = vadd.xlane.f32.xlu1 %v905_v36  ;;  %v1182_v35 = vld [vmem:[%s2261_s10 + $0x18] sm:$0xff] }
 0x373   : > { %v1134_v37 = vpop.xlane.xlu2 %1133 }
 0x374   : > { %v1135_v38 = vsub.f32 %v1131_v25, %v1134_v37  ;;  %v1077_v37 = vld [vmem:[%s2261_s10 + $0x10] sm:$0xff] }
 0x376   : > { %v1136_v39 = vmul.f32 1.442695, %v1135_v38 }
 0x378   : > { %v2094_v40 = vpop.eup %1584  ;;  %1586 = vpow2.f32 %v1136_v39 }
 0x379   : > { %v1033_v41 = vsel %vm791_vm8, %v2094_v40, 0.0 }
 0x37a   : > { %1034 = vadd.xlane.f32.xlu2 %v1033_v41 }
 0x37b   : > { %v829_v42 = vpop.xlane.xlu2 %828 }
 0x37c   : > { %1588 = vrcp.f32 %v829_v42  ;;  %v841_v48 = vand.u32 2147483648, %v829_v42  ;;  %v839_v50 = vand.u32 2147483647, %v829_v42  ;;  %vm835_vm11 = vweird.f32 %v829_v42 }
 0x37e   : > { %v2098_v43 = vpop.eup %1586  ;;  %v842_v52 = vor.u32 1.1754944e-38, %v841_v48  ;;  %vm840_vm13 = vcmp.eq.f32.partialorder %v839_v50, 8.507059e+37  ;;  %v1569_v48 = vld [vmem:[%s2311_s13] ss:$0 sm:$0xff] }
 0x37f   : > { %v1138_v44 = vsel %vm791_vm8, %v2098_v43, 0.0 }
 0x380   : > { %1139 = vadd.xlane.f32.xlu0 %v1138_v44 }
 0x382   : > { %v1589_v45 = vpop.eup %1588 }
 0x383   : > { %v831_v46 = vmul.f32 %v1589_v45, %v829_v42  ;;  %vm836_vm10 = vweird.f32 %v1589_v45 }
 0x384   : > { %vm837_vm12 = vmor %vm835_vm11, %vm836_vm10 }
 0x385   : > { %v832_v47 = vsub.f32 1.0, %v831_v46 }
 0x387   : > { %v833_v49 = vmul.f32 %v1589_v45, %v832_v47 }
 0x389   : > { %v834_v51 = vadd.f32 %v1589_v45, %v833_v49 }
 0x38b   : > { %924 = vrot.lane.b32.xlu1 %v2067_v62, %s1771_s11  ;;  %v838_v53 = vsel %vm837_vm12, %v1589_v45, %v834_v51 }
 0x38c   : > { %v843_v54 = vsel %vm840_vm13, %v842_v52, %v838_v53 }
 0x38d   : > { %v844_v55 = vmul.f32 %v1581_v27, %v843_v54 }
 0x38f   : > { %1479 = vmatmul.msk.f32.vlgmr.msrb.gmra.mxu1 %vm791_vm8, %v844_v55 }
 0x392   : > { %1051 = vrot.lane.b32.xlu2 %v2067_v62, %s1770_s29  ;;  %s2312_s29 = sld [smem:[#allocation27_spill]] }
 0x394   : > { %1156 = vrot.lane.b32.xlu0 %v2067_v62, %s1772_s21  ;;  %s2318_s21 = sld [smem:[#allocation30_spill]] }
 0x398   : > { %s2313_s11 = smov %s2312_s29 }
 0x3e5   : > { %v907_v56 = vpop.xlane.xlu1 %906 }
 0x3e6   : > { %1590 = vrcp.f32 %v907_v56  ;;  %v919_v3 = vand.u32 2147483648, %v907_v56  ;;  %vm913_vm15 = vweird.f32 %v907_v56  ;;  %v917_v4 = vand.u32 2147483647, %v907_v56 }
 0x3e8   : > { %v920_v7 = vor.u32 1.1754944e-38, %v919_v3  ;;  %vm918_vm2 = vcmp.eq.f32.partialorder %v917_v4, 8.507059e+37  ;;  %v1316_v3 = vld [vmem:[%s2314_s17 + $0x78] sm:$0xff]  ;;  %v1315_v4 = vld [vmem:[%s2314_s17 + $0x70] sm:$0xff] }
 0x3e9   : > { %1321 = vmatpush.msrb.mxu3 %v1316_v3 }
 0x3eb   : > { %1322 = vmatpush.msrb.mxu3 %v1315_v4 }
 0x3ec   : > { %v1591_v57 = vpop.eup %1590 }
 0x3ed   : > { %v909_v58 = vmul.f32 %v1591_v57, %v907_v56  ;;  %v1035_v59 = vpop.xlane.xlu2 %1034  ;;  %vm914_vm14 = vweird.f32 %v1591_v57 }
 0x3ee   : > { %1592 = vrcp.f32 %v1035_v59  ;;  %vm915_vm1 = vmor %vm913_vm15, %vm914_vm14  ;;  %v1047_v14 = vand.u32 2147483648, %v1035_v59  ;;  %vm1041_vm4 = vweird.f32 %v1035_v59  ;;  %v1045_v15 = vand.u32 2147483647, %v1035_v59 }
 0x3ef   : > { %v910_v60 = vsub.f32 1.0, %v909_v58  ;;  %v1262_v58 = vld [vmem:[%s2313_s11 + $0x8] sm:$0xff] }
 0x3f0   : > { %v1048_v24 = vor.u32 1.1754944e-38, %v1047_v14  ;;  %vm1046_vm7 = vcmp.eq.f32.partialorder %v1045_v15, 8.507059e+37 }
 0x3f1   : > { %v911_v61 = vmul.f32 %v1591_v57, %v910_v60 }
 0x3f3   : > { %v912_v63 = vadd.f32 %v1591_v57, %v911_v61  ;;  %v1140_v1 = vpop.xlane.xlu0 %1139 }
 0x3f4   : > { %v1593_v2 = vpop.eup %1592  ;;  %1594 = vrcp.f32 %v1140_v1  ;;  %v1152_v19 = vand.u32 2147483648, %v1140_v1  ;;  %v1150_v22 = vand.u32 2147483647, %v1140_v1  ;;  %vm1146_vm9 = vweird.f32 %v1140_v1 }
 0x3f5   : > { %v1037_v5 = vmul.f32 %v1593_v2, %v1035_v59  ;;  %v916_v6 = vsel %vm915_vm1, %v1591_v57, %v912_v63  ;;  %vm1042_vm3 = vweird.f32 %v1593_v2  ;;  %v1052_v23 = vpop.permute.xlu2 %1051  ;;  %v1264_v57 = vld [vmem:[%s2312_s29 + $0x18] sm:$0xff]  ;;  %s1495_s29 = sshll.u32 %s1889_s0, 3  ;;  %s1344_s0 = scalar_lea.sflag [#allocation4], %s1981_s12 }
 0x3f6   : > { %v921_v11 = vsel %vm918_vm2, %v920_v7, %v916_v6  ;;  %vm1043_vm5 = vmor %vm1041_vm4, %vm1042_vm3  ;;  %v1153_v27 = vor.u32 1.1754944e-38, %v1152_v19  ;;  %vm1151_vm11 = vcmp.eq.f32.partialorder %v1150_v22, 8.507059e+37  ;;  %v1314_v6 = vld [vmem:[%s2314_s17 + $0x68] sm:$0xff]  ;;  %v1313_v7 = vld [vmem:[%s2314_s17 + $0x60] sm:$0xff]  ;;  %s1354_s20 = scalar_lea.hbm %s2319_s22, %s1495_s29 }
 0x3f7   : > { %v1038_v62 = vsub.f32 1.0, %v1037_v5  ;;  %v922_v18 = vmul.f32 %v2090_v34, %v921_v11  ;;  %v868_v34 = vld [vmem:[%s2261_s10] sm:$0xff]  ;;  %1323 = vmatpush.msrb.mxu3 %v1314_v6  ;;  %s1358_s18 = sshll.u32 %s1354_s20, 4  ;;  %s1359_s18 = int_to_ptr.hbm [resolvable:$true] %s1358_s18 }
 0x3f8   : > { %992 = vmatpush.msra.mxu2 %v868_v34  ;;  %v1307_v34 = vld [vmem:[%s2314_s17 + $0x30] sm:$0xff]  ;;  %s1706_s26 = sshra.s32 %s1359_s18, 4  ;;  %s1707_s26 = int_to_ptr.hbm [resolvable:$true] %s1706_s26 }
 0x3f9   : > { %v1039_v9 = vmul.f32 %v1593_v2, %v1038_v62  ;;  %1324 = vmatpush.msrb.mxu3 %v1313_v7  ;;  %s1708_s13 = scalar_lea.hbm %s1707_s26, 8  ;;  %p1713_p10 = scmp.lt.s32.totalorder %s1707_s26, %s2319_s22 }
 0x3fa   : > { %v1595_v10 = vpop.eup %1594  ;;  %p1709_p1 = scmp.ne.s32.totalorder %s1707_s26, %s1708_s13  ;;  %p1714_p11 = scmp.lt.s32.totalorder %s1712_s16, %s1708_s13 }
 0x3fb   : > { %v1040_v12 = vadd.f32 %v1593_v2, %v1039_v9  ;;  %v1142_v13 = vmul.f32 %v1595_v10, %v1140_v1  ;;  %vm1147_vm6 = vweird.f32 %v1595_v10 }
 0x3fc   : > { %vm1148_vm10 = vmor %vm1146_vm9, %vm1147_vm6  ;;  %p1710_p4 = pnand %p1709_p1, %p1935_p7  ;;  %p1715_p2 = por %p1714_p11, %p1713_p10 }
 0x3fd   : > { %v1143_v16 = vsub.f32 1.0, %v1142_v13  ;;  %v925_v17 = vpop.permute.xlu1 %924  ;;  %v1044_v20 = vsel %vm1043_vm5, %v1593_v2, %v1040_v12 }
 0x3fe   : > { %945 = vmatpush.msra.mxu1 %v925_v17  ;;  %v1049_v26 = vsel %vm1046_vm7, %v1048_v24, %v1044_v20  ;;  %p1711_p8 = pneg %p1710_p4 }
 0x3ff   : > { %v1144_v21 = vmul.f32 %v1595_v10, %v1143_v16  ;;  %1482 = vmatmul.msk.f32.vlgmr.msra.gmra.mxu1 %vm791_vm8, %v922_v18  ;;  %v1050_v30 = vmul.f32 %v2094_v40, %v1049_v26  ;;  %v1570_v18 = vld [vmem:[%s2315_s30] ss:$0 sm:$0xff] }
 0x400   : > { %1072 = vmatpush.msrb.mxu1 %v1052_v23  ;;  %p1716_p12 = pnand %p1715_p2, %p1711_p8 }
 0x401   : > { %v1145_v25 = vadd.f32 %v1595_v10, %v1144_v21 }
 0x402   : > { %1201 = vmatpush.msra.mxu1 %v1182_v35  ;;  %v1306_v35 = vld [vmem:[%s2314_s17 + $0x28] sm:$0xff] }
 0x403   : > { %v1149_v28 = vsel %vm1148_vm10, %v1595_v10, %v1145_v25  ;;  %v1571_v25 = vld [vmem:[%s2316_s23] ss:$0 sm:$0xff] }
 0x404   : > { %v1154_v29 = vsel %vm1151_vm11, %v1153_v27, %v1149_v28 }
 0x405   : > { %v1155_v31 = vmul.f32 %v2098_v43, %v1154_v29  ;;  %v1312_v29 = vld [vmem:[%s2314_s17 + $0x58] sm:$0xff] }
 0x406   : > { %v1157_v32 = vpop.permute.xlu0 %1156  ;;  %1325 = vmatpush.msrb.mxu3 %v1312_v29 }
 0x407   : > { %1487 = vmatmul.msk.f32.vlgmr.msrb.gmra.mxu1 %vm791_vm8, %v1050_v30  ;;  %1177 = vmatpush.msra.mxu0 %v1157_v32  ;;  %v1311_v30 = vld [vmem:[%s2314_s17 + $0x50] sm:$0xff]  ;;  %v1309_v32 = vld [vmem:[%s2314_s17 + $0x40] sm:$0xff] }
 0x408   : > { %1491 = vmatmul.msk.f32.vlgmr.msra.gmra.mxu0 %vm791_vm8, %v1155_v31  ;;  %v1310_v31 = vld [vmem:[%s2314_s17 + $0x48] sm:$0xff]  ;;  %1326 = vmatpush.msrb.mxu3 %v1311_v30 }
 0x40a   : > { %1327 = vmatpush.msrb.mxu3 %v1310_v31 }
 0x40c   : > { %v865_v36 = vpop.f32.mrf.mxu1  ;;  %1328 = vmatpush.msrb.mxu3 %v1309_v32 }
 0x40e   : > { %1329 = vmatpush.msrb.mxu3 %v1308_v33 }
 0x410   : > { %1330 = vmatpush.msrb.mxu3 %v1307_v34 }
 0x412   : > { %1331 = vmatpush.msrb.mxu3 %v1306_v35 }
 0x47c   : > { %v947_v38 = vpop.f32.mrf.mxu1 }
 0x47d   : > { %1483 = vmatmul.msk.f32.vlgmr.msrb.gmra.mxu2 %vm791_vm8, %v947_v38  ;;  %v1303_v38 = vld [vmem:[%s2314_s17 + $0x10] sm:$0xff] }
 0x47e   : > { %1096 = vmatpush.msrb.mxu2 %v1077_v37  ;;  %v1304_v37 = vld [vmem:[%s2314_s17 + $0x18] sm:$0xff] }
 0x484   : > { %v1074_v40 = vpop.f32.mrf.mxu1 }
 0x485   : > { %1484 = vmatmul.msk.f32.vlgmr.msra.gmra.mxu2 %vm791_vm8, %v865_v36  ;;  %v1179_v39 = vpop.f32.mrf.mxu0  ;;  %v1305_v36 = vld [vmem:[%s2314_s17 + $0x20] sm:$0xff] }
 0x486   : > { %1492 = vmatmul.msk.f32.vlgmr.msra.gmra.mxu1 %vm791_vm8, %v1179_v39  ;;  %1284 = vmatpush.msra.mxu2 %v1264_v57  ;;  %v1302_v39 = vld [vmem:[%s2314_s17 + $0x8] sm:$0xff] }
 0x487   : > { %1332 = vmatpush.msrb.mxu3 %v1305_v36 }
 0x489   : > { %1333 = vmatpush.msrb.mxu3 %v1304_v37 }
 0x48b   : > { %1334 = vmatpush.msrb.mxu3 %v1303_v38 }
 0x48d   : > { %1488 = vmatmul.msk.f32.vlgmr.msrb.gmra.mxu2 %vm791_vm8, %v1074_v40  ;;  %v1301_v40 = vld [vmem:[%s2314_s17] sm:$0xff]  ;;  %1335 = vmatpush.msrb.mxu3 %v1302_v39 }
 0x48f   : > { %1336 = vmatpush.msrb.mxu3 %v1301_v40 }
 0x500   : > { %v971_v41 = vpop.f32.mrf.mxu2 }
 0x503   : > { %v1203_v46 = vpop.f32.mrf.mxu1 }
 0x508   : > { %v994_v42 = vpop.f32.mrf.mxu2 }
 0x509   : > { %v995_v43 = vadd.f32 %v994_v42, %v971_v41  ;;  %v1572_v41 = vld [vmem:[%s2317_s27] ss:$0 sm:$0xff] }
 0x510   : > { %v1098_v44 = vpop.f32.mrf.mxu2 }
 0x511   : > { %v1101_v45 = vadd.f32 %v1098_v44, %v995_v43 }
 0x513   : > { %v1206_v47 = vadd.f32 %v1203_v46, %v1101_v45 }
 0x515   : > { %v1207_v49 = vadd.f32 %v1206_v47, %v2002_v0  ;;  %v1263_v0 = vld [vmem:[%s2313_s11 + $0x10] sm:$0xff] }
 0x516   : > { %1285 = vmatpush.msra.mxu2 %v1263_v0 }
 0x517   : > { %v2135_v50 = vadd.f32 %v1569_v48, %v1207_v49 }
 0x518   : > { %1286 = vmatpush.msra.mxu2 %v1262_v58 }
 0x519   : > { %v1215_v51 = vsel %vm650_vm0, %v2135_v50, 0.0 }
 0x51a   : > { %1216 = vadd.xlane.f32.xlu1 %v1215_v51 }
 0x58d   : > { %v1217_v52 = vpop.xlane.xlu1 %1216 }
 0x58e   : > { %v1218_v53 = vmul.f32 %v1217_v52, %v2006_v8  ;;  %v1261_v8 = vld [vmem:[%s2313_s11] sm:$0xff] }
 0x58f   : > { %1287 = vmatpush.msra.mxu2 %v1261_v8 }
 0x590   : > { %v1219_v54 = vsub.f32 %v2135_v50, %v1218_v53 }
 0x592   : > { %v1220_v55 = vmul.f32 %v1219_v54, %v1219_v54  ;;  %v1255_v23 = vmul.f32 %v1570_v18, %v1219_v54  ;;  %v1573_v54 = vld [vmem:[%s2318_s21] ss:$0 sm:$0xff] }
 0x594   : > { %v1221_v56 = vsel %vm650_vm0, %v1220_v55, 0.0 }
 0x595   : > { %1222 = vadd.xlane.f32.xlu2 %v1221_v56 }
 0x608   : > { %v1223_v59 = vpop.xlane.xlu2 %1222 }
 0x609   : > { %v1224_v60 = vmul.f32 0.032258064, %v1223_v59 }
 0x60b   : > { %1596 = vrsqrt.f32 %v1224_v60  ;;  %vm1232_vm8 = vcmp.eq.f32.partialorder %v1224_v60, inf  ;;  %v1235_v10 = vand.u32 2147483648, %v1224_v60  ;;  %vm1234_vm12 = vcmp.eq.f32.partialorder %v1224_v60, 0.0 }
 0x611   : > { %v1597_v61 = vpop.eup %1596 }
 0x612   : > { %v1226_v63 = vmul.f32 %v1597_v61, %v1224_v60 }
 0x614   : > { %v1227_v1 = vmul.f32 %v1597_v61, %v1226_v63 }
 0x616   : > { %v1228_v2 = vmul.f32 0.5, %v1227_v1 }
 0x618   : > { %v1229_v5 = vsub.f32 1.5, %v1228_v2 }
 0x61a   : > { %v1230_v62 = vmul.f32 %v1597_v61, %v1229_v5 }
 0x61c   : > { %v1231_v9 = vmul.f32 %v1230_v62, %v1224_v60 }
 0x61e   : > { %v1233_v11 = vsel %vm1232_vm8, %v1224_v60, %v1231_v9 }
 0x61f   : > { %v1236_v12 = vsel %vm1234_vm12, %v1235_v10, %v1233_v11 }
 0x620   : > { %v1237_v13 = vadd.f32 1e-06, %v1236_v12 }
 0x622   : > { %1598 = vrcp.f32 %v1237_v13  ;;  %v1249_v17 = vand.u32 2147483648, %v1237_v13  ;;  %v1247_v20 = vand.u32 2147483647, %v1237_v13  ;;  %vm1243_vm14 = vweird.f32 %v1237_v13 }
 0x624   : > { %v1250_v22 = vor.u32 1.1754944e-38, %v1249_v17  ;;  %vm1248_vm1 = vcmp.eq.f32.partialorder %v1247_v20, 8.507059e+37 }
 0x628   : > { %v1599_v14 = vpop.eup %1598 }
 0x629   : > { %v1239_v15 = vmul.f32 %v1599_v14, %v1237_v13  ;;  %vm1244_vm13 = vweird.f32 %v1599_v14 }
 0x62a   : > { %vm1245_vm15 = vmor %vm1243_vm14, %vm1244_vm13 }
 0x62b   : > { %v1240_v16 = vsub.f32 1.0, %v1239_v15 }
 0x62d   : > { %v1241_v19 = vmul.f32 %v1599_v14, %v1240_v16 }
 0x62f   : > { %v1242_v21 = vadd.f32 %v1599_v14, %v1241_v19 }
 0x631   : > { %v1246_v24 = vsel %vm1245_vm15, %v1599_v14, %v1242_v21 }
 0x632   : > { %v1251_v26 = vsel %vm1248_vm1, %v1250_v22, %v1246_v24 }
 0x633   : > { %v1256_v27 = vmul.f32 %v1255_v23, %v1251_v26 }
 0x635   : > { %v1260_v28 = vadd.f32 %v1571_v25, %v1256_v27 }
 0x637   : > { %1493 = vmatmul.msk.f32.vlgmr.msra.gmra.mxu2 %vm650_vm0, %v1260_v28 }
 0x6ba   : > { %v1289_v42 = vpop.f32.mrf.mxu2 }
 0x6bb   : > { %v1290_v43 = vadd.f32 %v1572_v41, %v1289_v42 }
 0x6bd   : > { %v1293_v44 = vmul.f32 0.044715, %v1290_v43  ;;  %v1292_v51 = vmul.f32 0.5, %v1290_v43 }
 0x6bf   : > { %v1294_v45 = vmul.f32 %v1293_v44, %v1290_v43 }
 0x6c1   : > { %v1295_v46 = vmul.f32 %v1294_v45, %v1290_v43 }
 0x6c3   : > { %v1296_v47 = vadd.f32 %v1295_v46, %v1290_v43 }
 0x6c5   : > { %v1297_v48 = vmul.f32 0.7978846, %v1296_v47 }
 0x6c7   : > { %1600 = vtanh.f32 %v1297_v48 }
 0x6cd   : > { %v1601_v49 = vpop.eup %1600 }
 0x6ce   : > { %v1299_v52 = vadd.f32 1.0, %v1601_v49 }
 0x6d0   : > { %v1300_v53 = vmul.f32 %v1299_v52, %v1292_v51 }
 0x6d2   : > { %1337 = vmatmul.f32.vlgmr.msrb.gmra.mxu3 %v1300_v53 }
 0x755   : > { %v1338_v55 = vpop.f32.mrf.mxu3 }
 0x756   : > { %v1339_v56 = vadd.f32 %v1573_v54, %v1338_v55 }
 0x758   : > { %v1341_v57 = vadd.f32 %v1339_v56, %v2135_v50 }
 0x75a   : > { %1342 = vst.msk [vmem:[%s645_s25] sm:$0xff] %vm650_vm0, %v1341_v57 }
 0x75b   : > { %1719 = shalt.err (!%p1716_p12)
}
 0x75c   : > { %1506 = dma.vmem_to_hbm [thread:$0]  (%p1935_p7), %s1357_s14, 128, %s1359_s18, %s1344_s0  }
 0x75d PF: > { %s2321_s12 = sld [smem:[#allocation13_spill]] }
 0x75e   : > { %s2323_s21 = sld [smem:[#allocation15_spill]] }
 0x763   : > { %s1370_s23 = sand.u32 1, %s2321_s12  }
 0x764   : > { %p2324_p0 = scmp.ge.s32.totalorder %s2323_s21, 2  ;;  %s1371_s19 = scalar_lea.sflag [#allocation4], %s1370_s23 }
 0x766   : > { %p1520_p9 = pnand %p2324_p0, %p1903_p6 }
 0x768   : > { %p1521_p13 = pneg %p1520_p9 }
 0x76a   : > { %1749 = dma.done.wait (%p1521_p13), %s1371_s19, 128  }
 0x76b   : > { %1751 = vsyncadd (%p1521_p13), %s1371_s19, 4294967168  ;;  %s2325_s30 = sld [smem:[#allocation17_spill]]  ;;  %s2328_s27 = smov %s1758_s28 }
 0x76c   : > { %s2326_s20 = sld [smem:[#allocation14_spill]] }
 0x76d   : > { %s2327_s29 = sld [smem:[#allocation18_spill]] }
 0x771   : > { %p34_p3 = scmp.ge.s32.totalorder %s2325_s30, 4  }
 0x772   : > { %s2329_s28 = smov %s2326_s20 }
 0x773   :  { %36 = sbr.rel (!%p34_p3) target bundleno = 20 (0x14), region = 154 }
 0x778   :  { %1377 = vsyncpa [#allocation3], 1 }
 0x779   :  { %1379 = vsyncpa [#allocation3 + $0x1], 1 }
 0x77a   :  { %1380 = vsyncpa [#allocation6], 1 }
 0x77b   :  { %1382 = vsyncpa [#allocation6 + $0x1], 1 }
 0x77c   :  { %1383 = vsyncpa [#allocation4], 1 }
 0x77d   :  { %1385 = vsyncpa [#allocation4 + $0x1], 1 }

</bundles_post_ra>
